<compile_context>
chip_gen: v7x
topology: tpu7x:2x2x1
jax: 0.10.0
libtpu: 0.0.40
codegen_flags: <defaults>
</compile_context>

<pallas_src>
import jax
import jax.numpy as jnp
from jax.experimental import pallas as pl
from jax.experimental.pallas import tpu as pltpu

LN_EPS = 1e-5  # Task LayerNorm default eps


# ---------------------------------------------------------------------------
# small helpers
# ---------------------------------------------------------------------------
def _ru(n, m=128):
    """Round n up to a multiple of m (lane width)."""
    return ((n + m - 1) // m) * m


def _pad2(a, rows, cols, dtype):
    """Zero-pad a 2-D array into a (rows, cols) block of the given dtype."""
    out = jnp.zeros((rows, cols), dtype)
    return out.at[: a.shape[0], : a.shape[1]].set(a.astype(dtype))


def binary_pos_encoding(S):
    """(S, S) +/-1 binary positional code; exact integer arithmetic for the
    torch.linspace(0, S, steps=S).long() index sequence."""
    pos_idx = (jnp.arange(S, dtype=jnp.int32) * S) // jnp.int32(max(S - 1, 1))   # (S,)
    bin_msk = (2 ** jnp.arange(S - 1, -1, -1)).astype(jnp.int32)                 # (S,)
    bin_seq = jnp.bitwise_and(pos_idx[:, None], bin_msk[None, :]) != 0           # (S, S)
    return jnp.where(bin_seq, 1.0, -1.0).astype(jnp.float32)


def _linear_params(key, din, dout, bias=True):
    kw, kb = jax.random.split(key)
    lim = 1.0 / (din ** 0.5)
    w = jax.random.uniform(kw, (din, dout), jnp.float32, -lim, lim)
    b = jax.random.uniform(kb, (1, dout), jnp.float32, -lim, lim) if bias else None
    return w, b


# ---------------------------------------------------------------------------
# Parameter init: lane-padded, bf16 matmul weights, fused QKV, stacked layers
# ---------------------------------------------------------------------------
def init_mind_params(key, n_layer, vocab_size, block_size, d_model, d_feedforward):
    D = d_model + block_size                       # true Core feature dim
    Dp, Fp, Vp = _ru(D), _ru(d_feedforward), _ru(vocab_size)
    bf16, f32 = jnp.bfloat16, jnp.float32

    keys = jax.random.split(key, 2 + n_layer)

    # Embd: token table padded into the first d_model lanes of Dp
    wte = jax.random.normal(keys[0], (vocab_size, d_model), f32)
    wte_pad = _pad2(wte, vocab_size, Dp, bf16)                               # (V, Dp)

    # +/-1 positional code lives in lanes [d_model : d_model+S) of Dp
    pos = binary_pos_encoding(block_size)                                    # (S, S)
    pos_pad = jnp.zeros((block_size, Dp), f32)
    pos_pad = pos_pad.at[:, d_model:d_model + block_size].set(pos)           # (S, Dp)

    wqkv_l, bqkv_l, w1_l, b1_l, w2_l, b2_l = [], [], [], [], [], []
    for i in range(n_layer):
        kq, kk, kv, k1, k2 = jax.random.split(keys[2 + i], 5)
        wq, bq = _linear_params(kq, D, D)
        wk, bk = _linear_params(kk, D, D)
        wv, bv = _linear_params(kv, D, D)
        w1, b1 = _linear_params(k1, D, d_feedforward)
        w2, b2 = _linear_params(k2, d_feedforward, D)
        # each of q/k/v occupies its own 128-lane-aligned slab -> aligned slices in-kernel
        wqkv_l.append(jnp.concatenate([_pad2(wq, Dp, Dp, bf16),
                                       _pad2(wk, Dp, Dp, bf16),
                                       _pad2(wv, Dp, Dp, bf16)], axis=1))    # (Dp, 3Dp)
        bqkv_l.append(jnp.concatenate([_pad2(bq, 1, Dp, f32),
                                       _pad2(bk, 1, Dp, f32),
                                       _pad2(bv, 1, Dp, f32)], axis=1))      # (1, 3Dp)
        w1_l.append(_pad2(w1, Dp, Fp, bf16)); b1_l.append(_pad2(b1, 1, Fp, f32))
        w2_l.append(_pad2(w2, Fp, Dp, bf16)); b2_l.append(_pad2(b2, 1, Dp, f32))

    # Task: LayerNorm params (padded lanes zero so padded activation lanes map to 0)
    gamma = jnp.zeros((1, Dp), f32).at[:, :D].set(1.0)
    beta = jnp.zeros((1, Dp), f32)
    wh, _ = _linear_params(keys[1], D, vocab_size, bias=False)
    wh_pad = _pad2(wh, Dp, Vp, bf16)                                         # (Dp, Vp)

    return dict(
        d_true=D, vocab_size=vocab_size, block_size=block_size,
        wte=wte_pad, pos=pos_pad,
        wqkv=jnp.stack(wqkv_l), bqkv=jnp.stack(bqkv_l),
        w1=jnp.stack(w1_l), b1=jnp.stack(b1_l),
        w2=jnp.stack(w2_l), b2=jnp.stack(b2_l),
        gamma=gamma, beta=beta, wh=wh_pad,
    )


# ---------------------------------------------------------------------------
# Single fused pallas_call: Embd + n_layer x Core + Task (decode=False)
# ---------------------------------------------------------------------------
def mind_forward_fused(idx, params):
    B, S = idx.shape
    D_true = params["d_true"]
    V = params["vocab_size"]
    wte, pos = params["wte"], params["pos"]
    VOC, Dp = wte.shape
    Vp = params["wh"].shape[1]
    n_layer = params["wqkv"].shape[0]
    BS = B * S
    bf16 = jnp.bfloat16

    idx2 = idx.reshape(BS, 1).astype(jnp.int32)        # trivial host-side reshape

    def kernel(idx_ref, wte_ref, pos_ref, wqkv_ref, bqkv_ref, w1_ref, b1_ref,
               w2_ref, b2_ref, gamma_ref, beta_ref, wh_ref, o_ref):
        inv_scale = 1.0 / (float(D_true) ** 0.5)       # reference scale = dim_q ** 0.5
        inv_d = 1.0 / float(D_true)                    # LayerNorm over TRUE feature dim

        # --- Embd fused: one-hot gather (one MXU push) + precomputed positional code
        iota_v = jax.lax.broadcasted_iota(jnp.int32, (BS, VOC), 1)
        onehot = (idx_ref[...] == iota_v).astype(bf16)                      # (BS, VOC)
        tok = jnp.dot(onehot, wte_ref[...],
                      preferred_element_type=jnp.float32)                   # (BS, Dp)
        x = tok + jnp.concatenate([pos_ref[...]] * B, axis=0)               # (BS, Dp) f32

        for i in range(n_layer):                       # static; fine at small n_layer
            # --- attention: fused QKV projection, lane-aligned 128-wide slabs
            qkv = jnp.dot(x.astype(bf16), wqkv_ref[i],
                          preferred_element_type=jnp.float32) + bqkv_ref[i]  # (BS, 3Dp)
            q = qkv[:, :Dp].reshape(B, S, Dp)
            k = qkv[:, Dp:2 * Dp].reshape(B, S, Dp)
            v = qkv[:, 2 * Dp:].reshape(B, S, Dp)

            # NOTE: reference Core applies no causal mask (bidirectional attention).
            s = jnp.einsum('bqd,bkd->bqk', q.astype(bf16), k.astype(bf16),
                           preferred_element_type=jnp.float32) * inv_scale
            s = s - jnp.max(s, axis=-1, keepdims=True)
            e = jnp.exp(s)
            w = e * pl.reciprocal(jnp.sum(e, axis=-1, keepdims=True), approx=True)
            attn = jnp.einsum('bqk,bkd->bqd', w.astype(bf16), v.astype(bf16),
                              preferred_element_type=jnp.float32)            # (B, S, Dp)

            o = x + attn.reshape(BS, Dp)               # residual 1

            # --- MLP
            h = jnp.dot(o.astype(bf16), w1_ref[i],
                        preferred_element_type=jnp.float32) + b1_ref[i]
            h = jnp.maximum(h, 0.0)                    # ReLU
            f = jnp.dot(h.astype(bf16), w2_ref[i],
                        preferred_element_type=jnp.float32) + b2_ref[i]
            x = o + f                                  # residual 2 (padded lanes stay 0)

        # --- Task: LayerNorm (stats over TRUE D; padded lanes are zero) + head
        s1 = jnp.sum(x, axis=-1, keepdims=True)
        mu = s1 * inv_d
        s2 = jnp.sum(x * x, axis=-1, keepdims=True)
        var = s2 * inv_d - mu * mu
        xn = (x - mu) * jax.lax.rsqrt(var + LN_EPS)
        y = xn * gamma_ref[...] + beta_ref[...]        # padded gamma/beta=0 -> padded y=0
        o_ref[...] = jnp.dot(y.astype(bf16), wh_ref[...],
                             preferred_element_type=jnp.float32)             # (BS, Vp)
        # TODO(synk): Task decode=True branch (softmax + top-1 token decode) not exercised.

    vmem_spec = pl.BlockSpec(memory_space=pltpu.MemorySpace.VMEM)
    logits_pad = pl.pallas_call(
        kernel,
        out_shape=jax.ShapeDtypeStruct((BS, Vp), jnp.float32),
        in_specs=[vmem_spec] * 12,
        out_specs=vmem_spec,
    )(idx2, wte, pos, params["wqkv"], params["bqkv"], params["w1"], params["b1"],
      params["w2"], params["b2"], params["gamma"], params["beta"], params["wh"])

    # slice padded vocab lanes back; cheap wrapper-side op (lane-dense store in-kernel)
    return logits_pad[:, :V].reshape(B, S, V)


def mind_forward(I, params):
    """Mind.forward(I, decode=False) -> logits."""
    return mind_forward_fused(I, params)


# ---------------------------------------------------------------------------
if __name__ == "__main__":
    key = jax.random.PRNGKey(0)
    n_layer, vocab_size, block_size, d_model, d_feedforward = 2, 32, 16, 48, 128
    batch = 2

    k_params, k_idx = jax.random.split(key)
    params = init_mind_params(k_params, n_layer, vocab_size, block_size,
                              d_model, d_feedforward)
    I = jax.random.randint(k_idx, (batch, block_size), 0, vocab_size, dtype=jnp.int32)

    logits = mind_forward(I, params)                   # (B, S, vocab_size)
    jax.block_until_ready(logits)
    assert logits.shape == (batch, block_size, vocab_size)
    assert bool(jnp.all(jnp.isfinite(logits)))
    print("KERNEL_OK")
</pallas_src>

<mosaic_0001>
module attributes {stable_mosaic.version = 11 : i64} {
  func.func @kernel(%arg0: memref<32x1xi32, #tpu.memory_space<vmem>>, %arg1: memref<32x128xbf16, #tpu.memory_space<vmem>>, %arg2: memref<16x128xf32, #tpu.memory_space<vmem>>, %arg3: memref<2x128x384xbf16, #tpu.memory_space<vmem>>, %arg4: memref<2x1x384xf32, #tpu.memory_space<vmem>>, %arg5: memref<2x128x128xbf16, #tpu.memory_space<vmem>>, %arg6: memref<2x1x128xf32, #tpu.memory_space<vmem>>, %arg7: memref<2x128x128xbf16, #tpu.memory_space<vmem>>, %arg8: memref<2x1x128xf32, #tpu.memory_space<vmem>>, %arg9: memref<1x128xf32, #tpu.memory_space<vmem>>, %arg10: memref<1x128xf32, #tpu.memory_space<vmem>>, %arg11: memref<128x128xbf16, #tpu.memory_space<vmem>>, %arg12: memref<32x128xf32, #tpu.memory_space<vmem>>) attributes {dimension_semantics = [], scalar_prefetch = 0 : i64, scratch_operands = 0 : i64, tpu.core_type = #tpu.core_type<tc>} {
    %0 = tpu.iota {dimensions = array<i32: 1>} : vector<32x32xi32>
    %c0 = arith.constant 0 : index
    %c0_0 = arith.constant 0 : index
    %1 = vector.load %arg0[%c0, %c0_0] : memref<32x1xi32, #tpu.memory_space<vmem>>, vector<32x1xi32>
    %2 = vector.broadcast %1 : vector<32x1xi32> to vector<32x32xi32>
    %3 = arith.cmpi eq, %2, %0 : vector<32x32xi32>
    %4 = arith.extui %3 : vector<32x32xi1> to vector<32x32xi32>
    %5 = arith.sitofp %4 : vector<32x32xi32> to vector<32x32xf32>
    %6 = arith.truncf %5 : vector<32x32xf32> to vector<32x32xbf16>
    %c0_1 = arith.constant 0 : index
    %c0_2 = arith.constant 0 : index
    %7 = vector.load %arg1[%c0_1, %c0_2] : memref<32x128xbf16, #tpu.memory_space<vmem>>, vector<32x128xbf16>
    %cst = arith.constant dense<0.000000e+00> : vector<32x128xf32>
    %8 = tpu.matmul %6, %7, %cst {dimension_numbers = #tpu.dot_dimension_numbers<[1], [0], [0], [1], [0, 0, 1, 1], [], []>} : vector<32x32xbf16>, vector<32x128xbf16>, vector<32x128xf32> -> vector<32x128xf32>
    %c0_3 = arith.constant 0 : index
    %c0_4 = arith.constant 0 : index
    %9 = vector.load %arg2[%c0_3, %c0_4] : memref<16x128xf32, #tpu.memory_space<vmem>>, vector<16x128xf32>
    %10 = tpu.concatenate %9, %9 in 0 : vector<16x128xf32>, vector<16x128xf32> -> vector<32x128xf32>
    %11 = arith.addf %8, %10 : vector<32x128xf32>
    %12 = arith.truncf %11 : vector<32x128xf32> to vector<32x128xbf16>
    %c0_5 = arith.constant 0 : index
    %c0_6 = arith.constant 0 : index
    %c0_7 = arith.constant 0 : index
    %13 = vector.load %arg3[%c0_5, %c0_6, %c0_7] : memref<2x128x384xbf16, #tpu.memory_space<vmem>>, vector<1x128x384xbf16>
    %14 = vector.shape_cast %13 : vector<1x128x384xbf16> to vector<128x384xbf16>
    %cst_8 = arith.constant dense<0.000000e+00> : vector<32x384xf32>
    %15 = tpu.matmul %12, %14, %cst_8 {dimension_numbers = #tpu.dot_dimension_numbers<[1], [0], [0], [1], [0, 0, 1, 1], [], []>} : vector<32x128xbf16>, vector<128x384xbf16>, vector<32x384xf32> -> vector<32x384xf32>
    %c0_9 = arith.constant 0 : index
    %c0_10 = arith.constant 0 : index
    %c0_11 = arith.constant 0 : index
    %16 = vector.load %arg4[%c0_9, %c0_10, %c0_11] : memref<2x1x384xf32, #tpu.memory_space<vmem>>, vector<1x1x384xf32>
    %17 = vector.shape_cast %16 : vector<1x1x384xf32> to vector<1x384xf32>
    %18 = vector.broadcast %17 : vector<1x384xf32> to vector<32x384xf32>
    %19 = arith.addf %15, %18 : vector<32x384xf32>
    %20 = vector.extract_strided_slice %19 {offsets = [0, 0], sizes = [32, 128], strides = [1, 1]} : vector<32x384xf32> to vector<32x128xf32>
    %21 = vector.shape_cast %20 : vector<32x128xf32> to vector<2x16x128xf32>
    %22 = vector.extract_strided_slice %19 {offsets = [0, 128], sizes = [32, 128], strides = [1, 1]} : vector<32x384xf32> to vector<32x128xf32>
    %23 = vector.shape_cast %22 : vector<32x128xf32> to vector<2x16x128xf32>
    %24 = vector.extract_strided_slice %19 {offsets = [0, 256], sizes = [32, 128], strides = [1, 1]} : vector<32x384xf32> to vector<32x128xf32>
    %25 = vector.shape_cast %24 : vector<32x128xf32> to vector<2x16x128xf32>
    %26 = arith.truncf %21 : vector<2x16x128xf32> to vector<2x16x128xbf16>
    %27 = arith.truncf %23 : vector<2x16x128xf32> to vector<2x16x128xbf16>
    "tpu.trace_start"() <{level = 10 : i32, message = "bqd,bkd->bqk"}> : () -> ()
    %cst_12 = arith.constant dense<0.000000e+00> : vector<2x16x16xf32>
    %28 = tpu.matmul %26, %27, %cst_12 {dimension_numbers = #tpu.dot_dimension_numbers<[2], [2], [1], [1], [0, 0, 0, 1, 1, 1], [0], [0]>} : vector<2x16x128xbf16>, vector<2x16x128xbf16>, vector<2x16x16xf32> -> vector<2x16x16xf32>
    "tpu.trace_stop"() : () -> ()
    %cst_13 = arith.constant 1.250000e-01 : f32
    %29 = vector.broadcast %cst_13 : f32 to vector<2x16x16xf32>
    %30 = arith.mulf %28, %29 : vector<2x16x16xf32>
    %cst_14 = arith.constant dense<0xFF800000> : vector<2x16xf32>
    %31 = vector.multi_reduction <maximumf>, %30, %cst_14 [2] : vector<2x16x16xf32> to vector<2x16xf32>
    %32 = vector.shape_cast %31 : vector<2x16xf32> to vector<2x16x1xf32>
    %33 = vector.broadcast %32 : vector<2x16x1xf32> to vector<2x16x16xf32>
    %34 = arith.subf %30, %33 : vector<2x16x16xf32>
    %35 = math.exp %34 : vector<2x16x16xf32>
    %cst_15 = arith.constant dense<0.000000e+00> : vector<2x16xf32>
    %36 = vector.multi_reduction <add>, %35, %cst_15 [2] : vector<2x16x16xf32> to vector<2x16xf32>
    %37 = vector.shape_cast %36 : vector<2x16xf32> to vector<2x16x1xf32>
    %38 = tpu.reciprocal %37 {approx = true} : vector<2x16x1xf32> -> vector<2x16x1xf32>
    %39 = vector.broadcast %38 : vector<2x16x1xf32> to vector<2x16x16xf32>
    %40 = arith.mulf %35, %39 : vector<2x16x16xf32>
    %41 = arith.truncf %40 : vector<2x16x16xf32> to vector<2x16x16xbf16>
    %42 = arith.truncf %25 : vector<2x16x128xf32> to vector<2x16x128xbf16>
    "tpu.trace_start"() <{level = 10 : i32, message = "bqk,bkd->bqd"}> : () -> ()
    %cst_16 = arith.constant dense<0.000000e+00> : vector<2x16x128xf32>
    %43 = tpu.matmul %41, %42, %cst_16 {dimension_numbers = #tpu.dot_dimension_numbers<[2], [1], [1], [2], [0, 0, 0, 1, 1, 2], [0], [0]>} : vector<2x16x16xbf16>, vector<2x16x128xbf16>, vector<2x16x128xf32> -> vector<2x16x128xf32>
    "tpu.trace_stop"() : () -> ()
    %44 = vector.shape_cast %43 : vector<2x16x128xf32> to vector<32x128xf32>
    %45 = arith.addf %11, %44 : vector<32x128xf32>
    %46 = arith.truncf %45 : vector<32x128xf32> to vector<32x128xbf16>
    %c0_17 = arith.constant 0 : index
    %c0_18 = arith.constant 0 : index
    %c0_19 = arith.constant 0 : index
    %47 = vector.load %arg5[%c0_17, %c0_18, %c0_19] : memref<2x128x128xbf16, #tpu.memory_space<vmem>>, vector<1x128x128xbf16>
    %48 = vector.shape_cast %47 : vector<1x128x128xbf16> to vector<128x128xbf16>
    %cst_20 = arith.constant dense<0.000000e+00> : vector<32x128xf32>
    %49 = tpu.matmul %46, %48, %cst_20 {dimension_numbers = #tpu.dot_dimension_numbers<[1], [0], [0], [1], [0, 0, 1, 1], [], []>} : vector<32x128xbf16>, vector<128x128xbf16>, vector<32x128xf32> -> vector<32x128xf32>
    %c0_21 = arith.constant 0 : index
    %c0_22 = arith.constant 0 : index
    %c0_23 = arith.constant 0 : index
    %50 = vector.load %arg6[%c0_21, %c0_22, %c0_23] : memref<2x1x128xf32, #tpu.memory_space<vmem>>, vector<1x1x128xf32>
    %51 = vector.shape_cast %50 : vector<1x1x128xf32> to vector<1x128xf32>
    %52 = vector.broadcast %51 : vector<1x128xf32> to vector<32x128xf32>
    %53 = arith.addf %49, %52 : vector<32x128xf32>
    %cst_24 = arith.constant 0.000000e+00 : f32
    %54 = vector.broadcast %cst_24 : f32 to vector<32x128xf32>
    %55 = arith.maximumf %53, %54 : vector<32x128xf32>
    %56 = arith.truncf %55 : vector<32x128xf32> to vector<32x128xbf16>
    %c0_25 = arith.constant 0 : index
    %c0_26 = arith.constant 0 : index
    %c0_27 = arith.constant 0 : index
    %57 = vector.load %arg7[%c0_25, %c0_26, %c0_27] : memref<2x128x128xbf16, #tpu.memory_space<vmem>>, vector<1x128x128xbf16>
    %58 = vector.shape_cast %57 : vector<1x128x128xbf16> to vector<128x128xbf16>
    %cst_28 = arith.constant dense<0.000000e+00> : vector<32x128xf32>
    %59 = tpu.matmul %56, %58, %cst_28 {dimension_numbers = #tpu.dot_dimension_numbers<[1], [0], [0], [1], [0, 0, 1, 1], [], []>} : vector<32x128xbf16>, vector<128x128xbf16>, vector<32x128xf32> -> vector<32x128xf32>
    %c0_29 = arith.constant 0 : index
    %c0_30 = arith.constant 0 : index
    %c0_31 = arith.constant 0 : index
    %60 = vector.load %arg8[%c0_29, %c0_30, %c0_31] : memref<2x1x128xf32, #tpu.memory_space<vmem>>, vector<1x1x128xf32>
    %61 = vector.shape_cast %60 : vector<1x1x128xf32> to vector<1x128xf32>
    %62 = vector.broadcast %61 : vector<1x128xf32> to vector<32x128xf32>
    %63 = arith.addf %59, %62 : vector<32x128xf32>
    %64 = arith.addf %45, %63 : vector<32x128xf32>
    %65 = arith.truncf %64 : vector<32x128xf32> to vector<32x128xbf16>
    %c1 = arith.constant 1 : index
    %c0_32 = arith.constant 0 : index
    %c0_33 = arith.constant 0 : index
    %66 = vector.load %arg3[%c1, %c0_32, %c0_33] : memref<2x128x384xbf16, #tpu.memory_space<vmem>>, vector<1x128x384xbf16>
    %67 = vector.shape_cast %66 : vector<1x128x384xbf16> to vector<128x384xbf16>
    %cst_34 = arith.constant dense<0.000000e+00> : vector<32x384xf32>
    %68 = tpu.matmul %65, %67, %cst_34 {dimension_numbers = #tpu.dot_dimension_numbers<[1], [0], [0], [1], [0, 0, 1, 1], [], []>} : vector<32x128xbf16>, vector<128x384xbf16>, vector<32x384xf32> -> vector<32x384xf32>
    %c1_35 = arith.constant 1 : index
    %c0_36 = arith.constant 0 : index
    %c0_37 = arith.constant 0 : index
    %69 = vector.load %arg4[%c1_35, %c0_36, %c0_37] : memref<2x1x384xf32, #tpu.memory_space<vmem>>, vector<1x1x384xf32>
    %70 = vector.shape_cast %69 : vector<1x1x384xf32> to vector<1x384xf32>
    %71 = vector.broadcast %70 : vector<1x384xf32> to vector<32x384xf32>
    %72 = arith.addf %68, %71 : vector<32x384xf32>
    %73 = vector.extract_strided_slice %72 {offsets = [0, 0], sizes = [32, 128], strides = [1, 1]} : vector<32x384xf32> to vector<32x128xf32>
    %74 = vector.shape_cast %73 : vector<32x128xf32> to vector<2x16x128xf32>
    %75 = vector.extract_strided_slice %72 {offsets = [0, 128], sizes = [32, 128], strides = [1, 1]} : vector<32x384xf32> to vector<32x128xf32>
    %76 = vector.shape_cast %75 : vector<32x128xf32> to vector<2x16x128xf32>
    %77 = vector.extract_strided_slice %72 {offsets = [0, 256], sizes = [32, 128], strides = [1, 1]} : vector<32x384xf32> to vector<32x128xf32>
    %78 = vector.shape_cast %77 : vector<32x128xf32> to vector<2x16x128xf32>
    %79 = arith.truncf %74 : vector<2x16x128xf32> to vector<2x16x128xbf16>
    %80 = arith.truncf %76 : vector<2x16x128xf32> to vector<2x16x128xbf16>
    "tpu.trace_start"() <{level = 10 : i32, message = "bqd,bkd->bqk"}> : () -> ()
    %cst_38 = arith.constant dense<0.000000e+00> : vector<2x16x16xf32>
    %81 = tpu.matmul %79, %80, %cst_38 {dimension_numbers = #tpu.dot_dimension_numbers<[2], [2], [1], [1], [0, 0, 0, 1, 1, 1], [0], [0]>} : vector<2x16x128xbf16>, vector<2x16x128xbf16>, vector<2x16x16xf32> -> vector<2x16x16xf32>
    "tpu.trace_stop"() : () -> ()
    %cst_39 = arith.constant 1.250000e-01 : f32
    %82 = vector.broadcast %cst_39 : f32 to vector<2x16x16xf32>
    %83 = arith.mulf %81, %82 : vector<2x16x16xf32>
    %cst_40 = arith.constant dense<0xFF800000> : vector<2x16xf32>
    %84 = vector.multi_reduction <maximumf>, %83, %cst_40 [2] : vector<2x16x16xf32> to vector<2x16xf32>
    %85 = vector.shape_cast %84 : vector<2x16xf32> to vector<2x16x1xf32>
    %86 = vector.broadcast %85 : vector<2x16x1xf32> to vector<2x16x16xf32>
    %87 = arith.subf %83, %86 : vector<2x16x16xf32>
    %88 = math.exp %87 : vector<2x16x16xf32>
    %cst_41 = arith.constant dense<0.000000e+00> : vector<2x16xf32>
    %89 = vector.multi_reduction <add>, %88, %cst_41 [2] : vector<2x16x16xf32> to vector<2x16xf32>
    %90 = vector.shape_cast %89 : vector<2x16xf32> to vector<2x16x1xf32>
    %91 = tpu.reciprocal %90 {approx = true} : vector<2x16x1xf32> -> vector<2x16x1xf32>
    %92 = vector.broadcast %91 : vector<2x16x1xf32> to vector<2x16x16xf32>
    %93 = arith.mulf %88, %92 : vector<2x16x16xf32>
    %94 = arith.truncf %93 : vector<2x16x16xf32> to vector<2x16x16xbf16>
    %95 = arith.truncf %78 : vector<2x16x128xf32> to vector<2x16x128xbf16>
    "tpu.trace_start"() <{level = 10 : i32, message = "bqk,bkd->bqd"}> : () -> ()
    %cst_42 = arith.constant dense<0.000000e+00> : vector<2x16x128xf32>
    %96 = tpu.matmul %94, %95, %cst_42 {dimension_numbers = #tpu.dot_dimension_numbers<[2], [1], [1], [2], [0, 0, 0, 1, 1, 2], [0], [0]>} : vector<2x16x16xbf16>, vector<2x16x128xbf16>, vector<2x16x128xf32> -> vector<2x16x128xf32>
    "tpu.trace_stop"() : () -> ()
    %97 = vector.shape_cast %96 : vector<2x16x128xf32> to vector<32x128xf32>
    %98 = arith.addf %64, %97 : vector<32x128xf32>
    %99 = arith.truncf %98 : vector<32x128xf32> to vector<32x128xbf16>
    %c1_43 = arith.constant 1 : index
    %c0_44 = arith.constant 0 : index
    %c0_45 = arith.constant 0 : index
    %100 = vector.load %arg5[%c1_43, %c0_44, %c0_45] : memref<2x128x128xbf16, #tpu.memory_space<vmem>>, vector<1x128x128xbf16>
    %101 = vector.shape_cast %100 : vector<1x128x128xbf16> to vector<128x128xbf16>
    %cst_46 = arith.constant dense<0.000000e+00> : vector<32x128xf32>
    %102 = tpu.matmul %99, %101, %cst_46 {dimension_numbers = #tpu.dot_dimension_numbers<[1], [0], [0], [1], [0, 0, 1, 1], [], []>} : vector<32x128xbf16>, vector<128x128xbf16>, vector<32x128xf32> -> vector<32x128xf32>
    %c1_47 = arith.constant 1 : index
    %c0_48 = arith.constant 0 : index
    %c0_49 = arith.constant 0 : index
    %103 = vector.load %arg6[%c1_47, %c0_48, %c0_49] : memref<2x1x128xf32, #tpu.memory_space<vmem>>, vector<1x1x128xf32>
    %104 = vector.shape_cast %103 : vector<1x1x128xf32> to vector<1x128xf32>
    %105 = vector.broadcast %104 : vector<1x128xf32> to vector<32x128xf32>
    %106 = arith.addf %102, %105 : vector<32x128xf32>
    %cst_50 = arith.constant 0.000000e+00 : f32
    %107 = vector.broadcast %cst_50 : f32 to vector<32x128xf32>
    %108 = arith.maximumf %106, %107 : vector<32x128xf32>
    %109 = arith.truncf %108 : vector<32x128xf32> to vector<32x128xbf16>
    %c1_51 = arith.constant 1 : index
    %c0_52 = arith.constant 0 : index
    %c0_53 = arith.constant 0 : index
    %110 = vector.load %arg7[%c1_51, %c0_52, %c0_53] : memref<2x128x128xbf16, #tpu.memory_space<vmem>>, vector<1x128x128xbf16>
    %111 = vector.shape_cast %110 : vector<1x128x128xbf16> to vector<128x128xbf16>
    %cst_54 = arith.constant dense<0.000000e+00> : vector<32x128xf32>
    %112 = tpu.matmul %109, %111, %cst_54 {dimension_numbers = #tpu.dot_dimension_numbers<[1], [0], [0], [1], [0, 0, 1, 1], [], []>} : vector<32x128xbf16>, vector<128x128xbf16>, vector<32x128xf32> -> vector<32x128xf32>
    %c1_55 = arith.constant 1 : index
    %c0_56 = arith.constant 0 : index
    %c0_57 = arith.constant 0 : index
    %113 = vector.load %arg8[%c1_55, %c0_56, %c0_57] : memref<2x1x128xf32, #tpu.memory_space<vmem>>, vector<1x1x128xf32>
    %114 = vector.shape_cast %113 : vector<1x1x128xf32> to vector<1x128xf32>
    %115 = vector.broadcast %114 : vector<1x128xf32> to vector<32x128xf32>
    %116 = arith.addf %112, %115 : vector<32x128xf32>
    %117 = arith.addf %98, %116 : vector<32x128xf32>
    %cst_58 = arith.constant dense<0.000000e+00> : vector<32xf32>
    %118 = vector.multi_reduction <add>, %117, %cst_58 [1] : vector<32x128xf32> to vector<32xf32>
    %119 = vector.shape_cast %118 : vector<32xf32> to vector<32x1xf32>
    %cst_59 = arith.constant 1.562500e-02 : f32
    %120 = vector.broadcast %cst_59 : f32 to vector<32x1xf32>
    %121 = arith.mulf %119, %120 : vector<32x1xf32>
    %122 = arith.mulf %117, %117 : vector<32x128xf32>
    %cst_60 = arith.constant dense<0.000000e+00> : vector<32xf32>
    %123 = vector.multi_reduction <add>, %122, %cst_60 [1] : vector<32x128xf32> to vector<32xf32>
    %124 = vector.shape_cast %123 : vector<32xf32> to vector<32x1xf32>
    %cst_61 = arith.constant 1.562500e-02 : f32
    %125 = vector.broadcast %cst_61 : f32 to vector<32x1xf32>
    %126 = arith.mulf %124, %125 : vector<32x1xf32>
    %127 = arith.mulf %121, %121 : vector<32x1xf32>
    %128 = arith.subf %126, %127 : vector<32x1xf32>
    %129 = vector.broadcast %121 : vector<32x1xf32> to vector<32x128xf32>
    %130 = arith.subf %117, %129 : vector<32x128xf32>
    %cst_62 = arith.constant 9.99999974E-6 : f32
    %131 = vector.broadcast %cst_62 : f32 to vector<32x1xf32>
    %132 = arith.addf %128, %131 : vector<32x1xf32>
    %133 = math.rsqrt %132 : vector<32x1xf32>
    %134 = vector.broadcast %133 : vector<32x1xf32> to vector<32x128xf32>
    %135 = arith.mulf %130, %134 : vector<32x128xf32>
    %c0_63 = arith.constant 0 : index
    %c0_64 = arith.constant 0 : index
    %136 = vector.load %arg9[%c0_63, %c0_64] : memref<1x128xf32, #tpu.memory_space<vmem>>, vector<1x128xf32>
    %137 = vector.broadcast %136 : vector<1x128xf32> to vector<32x128xf32>
    %138 = arith.mulf %135, %137 : vector<32x128xf32>
    %c0_65 = arith.constant 0 : index
    %c0_66 = arith.constant 0 : index
    %139 = vector.load %arg10[%c0_65, %c0_66] : memref<1x128xf32, #tpu.memory_space<vmem>>, vector<1x128xf32>
    %140 = vector.broadcast %139 : vector<1x128xf32> to vector<32x128xf32>
    %141 = arith.addf %138, %140 : vector<32x128xf32>
    %142 = arith.truncf %141 : vector<32x128xf32> to vector<32x128xbf16>
    %c0_67 = arith.constant 0 : index
    %c0_68 = arith.constant 0 : index
    %143 = vector.load %arg11[%c0_67, %c0_68] : memref<128x128xbf16, #tpu.memory_space<vmem>>, vector<128x128xbf16>
    %cst_69 = arith.constant dense<0.000000e+00> : vector<32x128xf32>
    %144 = tpu.matmul %142, %143, %cst_69 {dimension_numbers = #tpu.dot_dimension_numbers<[1], [0], [0], [1], [0, 0, 1, 1], [], []>} : vector<32x128xbf16>, vector<128x128xbf16>, vector<32x128xf32> -> vector<32x128xf32>
    %c0_70 = arith.constant 0 : index
    %c0_71 = arith.constant 0 : index
    %145 = vector.load %arg12[%c0_70, %c0_71] : memref<32x128xf32, #tpu.memory_space<vmem>>, vector<32x128xf32>
    tpu.vector_store %arg12[%c0_70, %c0_71], %144 {strides = array<i32>} : memref<32x128xf32, #tpu.memory_space<vmem>>, vector<32x128xf32>,
    return
  }
}

</mosaic_0001>

<bundles_post_ra>
// kernel: tpu_custom_call.1
= control target key start
LH: loop header
LB: loop body
LE: loop exit
PB: predicated region body
PF: predicated region fallthrough
CT: control target
= control target key end

     0   :  { %17 = vsyncpa [#allocation3], 0  ;;  %s3124_s0 = inlined_call_operand.vmem [shape: s32[32,1], index: 0, kind: input, shape index: {}]   ;;  %s3125_s1 = inlined_call_operand.hbm [shape: bf16[32,128], index: 1, kind: input, shape index: {}]   ;;  %s3126_s2 = inlined_call_operand.hbm [shape: f32[16,128], index: 2, kind: input, shape index: {}]   ;;  %s3127_s3 = inlined_call_operand.hbm [shape: bf16[2,128,384], index: 3, kind: input, shape index: {}]   ;;  %s3128_s4 = inlined_call_operand.vmem [shape: f32[2,1,384], index: 4, kind: input, shape index: {}]   ;;  %s3129_s5 = inlined_call_operand.hbm [shape: bf16[2,128,128], index: 5, kind: input, shape index: {}]   ;;  %s3130_s6 = inlined_call_operand.vmem [shape: f32[2,1,128], index: 6, kind: input, shape index: {}]   ;;  %s3131_s7 = inlined_call_operand.hbm [shape: bf16[2,128,128], index: 7, kind: input, shape index: {}]   ;;  %s3132_s8 = inlined_call_operand.vmem [shape: f32[2,1,128], index: 8, kind: input, shape index: {}]   ;;  %s3133_s9 = inlined_call_operand.hbm [shape: f32[1,128], index: 9, kind: input, shape index: {}]   ;;  %s3134_s10 = inlined_call_operand.hbm [shape: f32[1,128], index: 10, kind: input, shape index: {}]   ;;  %s3135_s11 = inlined_call_operand.vmem [shape: bf16[128,128], index: 11, kind: input, shape index: {}]   ;;  %s3136_s12 = inlined_call_operand.hbm [shape: f32[32,128], index: 12, kind: output, shape index: {}]  }
   0x1   :  { %18 = vsyncpa [#allocation6], 0 }
   0x2   :  { %19 = vsyncpa [#allocation9], 0 }
   0x3   :  { %20 = vsyncpa [#allocation12], 0 }
   0x4   :  { %21 = vsyncpa [#allocation4], 0  ;;  %s2732_s21 = smov [#allocation5]   ;;  %s2546_s25 = scalar_lea.hbm %s3126_s2, 256 }
   0x5   :  { %s41_s22 = sshll.u32 %s2732_s21, 4  ;;  %p2547_p0 = scmp.ne.s32.totalorder %s3126_s2, %s2546_s25  ;;  %s42_s22 = int_to_ptr.vmem [resolvable:$true] %s41_s22 }
   0x6   :  { %p2550_p1 = scmp.lt.u32.totalorder %s2546_s25, %s3126_s2 }
   0x8   :  { %p2552_p2 = pnand %p2550_p1, %p2547_p0 }
   0xa   :  { %2555 = shalt.err (!%p2552_p2)
}
   0xb   :  { %s2556_s30 = scalar_lea.vmem %s42_s22, 256  ;;  %p2561_p4 = scmp.lt.s32.totalorder %s42_s22, %s42_s22 }
   0xc   :  { %p2557_p3 = scmp.ne.s32.totalorder %s42_s22, %s2556_s30  ;;  %p2562_p5 = scmp.lt.s32.totalorder %s2556_s30, %s2556_s30 }
   0xe   :  { %p2563_p6 = por %p2562_p5, %p2561_p4 }
  0x10   :  { %p2564_p7 = pnand %p2563_p6, %p2557_p3 }
  0x12   :  { %2567 = shalt.err (!%p2564_p7)
}
  0x13   :  { %s2733_s13 = smov 128   ;;  %s2734_s14 = smov 8  }
  0x14   :  { %47 = dma.hbm_to_vmem [thread:$0]  %s3126_s2, 256, %s42_s22, [#allocation6], %s2733_s13, %s2733_s13, %s2734_s14  }
  0x15   :  { %s2735_s17 = smov [#allocation8]   ;;  %s2736_s19 = smov [#allocation11]  }
  0x16   :  { %s67_s18 = sshll.u32 %s2735_s17, 4  ;;  %s96_s20 = sshll.u32 %s2736_s19, 4  ;;  %s68_s18 = int_to_ptr.vmem [resolvable:$true] %s67_s18  ;;  %s97_s20 = int_to_ptr.vmem [resolvable:$true] %s96_s20 }
  0x17   :  { %s2568_s24 = scalar_lea.hbm %s3129_s5, 2048 }
  0x18   :  { %p2569_p8 = scmp.ne.s32.totalorder %s3129_s5, %s2568_s24  ;;  %p2572_p9 = scmp.lt.u32.totalorder %s2568_s24, %s3129_s5 }
  0x1a   :  { %p2574_p10 = pnand %p2572_p9, %p2569_p8 }
  0x1c   :  { %2577 = shalt.err (!%p2574_p10)
}
  0x1d   :  { %s2578_s2 = scalar_lea.vmem %s68_s18, 2048  ;;  %p2583_p12 = scmp.lt.s32.totalorder %s68_s18, %s68_s18 }
  0x1e   :  { %p2579_p11 = scmp.ne.s32.totalorder %s68_s18, %s2578_s2  ;;  %p2584_p13 = scmp.lt.s32.totalorder %s2578_s2, %s2578_s2 }
  0x20   :  { %p2585_p0 = por %p2584_p13, %p2583_p12 }
  0x22   :  { %p2586_p1 = pnand %p2585_p0, %p2579_p11 }
  0x24   :  { %2589 = shalt.err (!%p2586_p1)
}
  0x25   :  { %s2737_s22 = smov 64   ;;  %s2738_s29 = smov 4  }
  0x26   :  { %73 = dma.hbm_to_vmem [thread:$0]  %s3129_s5, 2048, %s68_s18, [#allocation9], %s2737_s22, %s2737_s22, %s2738_s29  }
  0x27   :  { %s2590_s19 = scalar_lea.hbm %s3133_s9, 16 }
  0x28   :  { %p2591_p2 = scmp.ne.s32.totalorder %s3133_s9, %s2590_s19  ;;  %p2594_p3 = scmp.lt.u32.totalorder %s2590_s19, %s3133_s9 }
  0x2a   :  { %p2596_p4 = pnand %p2594_p3, %p2591_p2 }
  0x2c   :  { %2599 = shalt.err (!%p2596_p4)
}
  0x2d   :  { %s2600_s26 = scalar_lea.vmem %s97_s20, 16  ;;  %s2604_s27 = scalar_lea.vmem %s97_s20, 32 }
  0x2e   :  { %p2601_p5 = scmp.ne.s32.totalorder %s97_s20, %s2600_s26  ;;  %p2605_p6 = scmp.lt.s32.totalorder %s97_s20, %s97_s20 }
  0x2f   :  { %p2606_p7 = scmp.lt.s32.totalorder %s2604_s27, %s2600_s26 }
  0x31   :  { %p2607_p8 = por %p2606_p7, %p2605_p6 }
  0x33   :  { %p2608_p9 = pnand %p2607_p8, %p2601_p5 }
  0x35   :  { %2611 = shalt.err (!%p2608_p9)
}
  0x36   :  { %99 = dma.hbm_to_vmem [thread:$0]  %s3133_s9, 16, %s97_s20, [#allocation12]  }
  0x37   :  { %s2739_s28 = smov [#allocation2]   ;;  %s2740_s30 = smov [#allocation7]  }
  0x38   :  { %s29_s2 = sshll.u32 %s2739_s28, 4  ;;  %s53_s15 = sshll.u32 %s2740_s30, 4  ;;  %s30_s2 = int_to_ptr.vmem [resolvable:$true] %s29_s2  ;;  %s54_s15 = int_to_ptr.vmem [resolvable:$true] %s53_s15 }
  0x39   :  { %s2612_s19 = scalar_lea.hbm %s3125_s1, 256 }
  0x3a   :  { %p2613_p10 = scmp.ne.s32.totalorder %s3125_s1, %s2612_s19  ;;  %p2616_p11 = scmp.lt.u32.totalorder %s2612_s19, %s3125_s1 }
  0x3c   :  { %p2618_p12 = pnand %p2616_p11, %p2613_p10 }
  0x3e   :  { %2621 = shalt.err (!%p2618_p12)
}
  0x3f   :  { %s2622_s9 = scalar_lea.vmem %s30_s2, 256  ;;  %p2627_p0 = scmp.lt.s32.totalorder %s30_s2, %s30_s2 }
  0x40   :  { %p2623_p13 = scmp.ne.s32.totalorder %s30_s2, %s2622_s9  ;;  %p2628_p1 = scmp.lt.s32.totalorder %s2622_s9, %s2622_s9 }
  0x42   :  { %p2629_p2 = por %p2628_p1, %p2627_p0 }
  0x44   :  { %p2630_p3 = pnand %p2629_p2, %p2623_p13 }
  0x46   :  { %2633 = shalt.err (!%p2630_p3)
}
  0x47   :  { %35 = dma.hbm_to_vmem [thread:$0]  %s3125_s1, 256, %s30_s2, [#allocation3], %s2737_s22, %s2737_s22, %s2738_s29  }
  0x48   :  { %s2634_s18 = scalar_lea.hbm %s3127_s3, 6144 }
  0x49   :  { %p2635_p4 = scmp.ne.s32.totalorder %s3127_s3, %s2634_s18  ;;  %p2638_p5 = scmp.lt.u32.totalorder %s2634_s18, %s3127_s3 }
  0x4b   :  { %p2640_p6 = pnand %p2638_p5, %p2635_p4 }
  0x4d   :  { %2643 = shalt.err (!%p2640_p6)
}
  0x4e   :  { %s2644_s19 = scalar_lea.vmem %s54_s15, 6144  ;;  %p2649_p8 = scmp.lt.s32.totalorder %s54_s15, %s54_s15 }
  0x4f   :  { %p2645_p7 = scmp.ne.s32.totalorder %s54_s15, %s2644_s19  ;;  %p2650_p9 = scmp.lt.s32.totalorder %s2644_s19, %s2644_s19 }
  0x51   :  { %p2651_p10 = por %p2650_p9, %p2649_p8 }
  0x53   :  { %p2652_p11 = pnand %p2651_p10, %p2645_p7 }
  0x55   :  { %2655 = shalt.err (!%p2652_p11)
}
  0x56   :  { %s2741_s1 = smov 192   ;;  %s2742_s2 = smov 12  }
  0x57   :  { %59 = dma.hbm_to_vmem [thread:$0]  %s3127_s3, 6144, %s54_s15, [#allocation6], %s2741_s1, %s2741_s1, %s2742_s2  }
  0x58   :  { %s2743_s24 = smov [#allocation10]   ;;  %s2744_s9 = smov [#allocation13]  }
  0x59   :  { %s81_s25 = sshll.u32 %s2743_s24, 4  ;;  %s106_s20 = sshll.u32 %s2744_s9, 4  ;;  %s82_s25 = int_to_ptr.vmem [resolvable:$true] %s81_s25  ;;  %s107_s20 = int_to_ptr.vmem [resolvable:$true] %s106_s20 }
  0x5a   :  { %s2656_s5 = scalar_lea.hbm %s3131_s7, 2048 }
  0x5b   :  { %p2657_p12 = scmp.ne.s32.totalorder %s3131_s7, %s2656_s5  ;;  %p2660_p13 = scmp.lt.u32.totalorder %s2656_s5, %s3131_s7 }
  0x5d   :  { %p2662_p0 = pnand %p2660_p13, %p2657_p12 }
  0x5f   :  { %2665 = shalt.err (!%p2662_p0)
}
  0x60   :  { %s2666_s3 = scalar_lea.vmem %s82_s25, 2048  ;;  %p2671_p2 = scmp.lt.s32.totalorder %s82_s25, %s82_s25 }
  0x61   :  { %p2667_p1 = scmp.ne.s32.totalorder %s82_s25, %s2666_s3  ;;  %p2672_p3 = scmp.lt.s32.totalorder %s2666_s3, %s2666_s3 }
  0x63   :  { %p2673_p4 = por %p2672_p3, %p2671_p2 }
  0x65   :  { %p2674_p5 = pnand %p2673_p4, %p2667_p1 }
  0x67   :  { %2677 = shalt.err (!%p2674_p5)
}
  0x68   :  { %87 = dma.hbm_to_vmem [thread:$0]  %s3131_s7, 2048, %s82_s25, [#allocation9], %s2737_s22, %s2737_s22, %s2738_s29  }
  0x69   :  { %s2678_s2 = scalar_lea.hbm %s3134_s10, 16 }
  0x6a   :  { %p2679_p6 = scmp.ne.s32.totalorder %s3134_s10, %s2678_s2  ;;  %p2682_p7 = scmp.lt.u32.totalorder %s2678_s2, %s3134_s10 }
  0x6c   :  { %p2684_p8 = pnand %p2682_p7, %p2679_p6 }
  0x6e   :  { %2687 = shalt.err (!%p2684_p8)
}
  0x6f   :  { %s2688_s26 = scalar_lea.vmem %s107_s20, 16  ;;  %s2692_s27 = scalar_lea.vmem %s107_s20, 32 }
  0x70   :  { %p2689_p9 = scmp.ne.s32.totalorder %s107_s20, %s2688_s26  ;;  %p2693_p10 = scmp.lt.s32.totalorder %s107_s20, %s107_s20 }
  0x71   :  { %p2694_p11 = scmp.lt.s32.totalorder %s2692_s27, %s2688_s26 }
  0x73   :  { %p2695_p12 = por %p2694_p11, %p2693_p10 }
  0x75   :  { %p2696_p13 = pnand %p2695_p12, %p2689_p9 }
  0x77   :  { %2699 = shalt.err (!%p2696_p13)
}
  0x78   :  { %109 = dma.hbm_to_vmem [thread:$0]  %s3134_s10, 16, %s107_s20, [#allocation12]  }
  0x79   :  { %2722 = dma.done.wait [#allocation3], 256  }
  0x7a   :  { %2723 = vsyncadd [#allocation3], 4294967040 }
  0x7b   :  { %2724 = dma.done.wait [#allocation6], 6400  }
  0x7c   :  { %2725 = vsyncadd [#allocation6], 4294960896 }
  0x7d   :  { %2726 = dma.done.wait [#allocation9], 4096  }
  0x7e   :  { %2727 = vsyncadd [#allocation9], 4294963200 }
  0x7f   :  { %2728 = dma.done.wait [#allocation12], 32  }
  0x80   :  { %2729 = vsyncadd [#allocation12], 4294967264  ;;  %v2745_v0 = vmov 0   ;;  %v138_v1 = vld [vmem:[%s3124_s0 + $0x10] sm:$0xff]  ;;  %v136_v2 = vld [vmem:[%s3124_s0] sm:$0xff]  ;;  %v134_v20 = vlaneseq  ;;  %vm184_vm4 = vcmask 261120  }
  0x81   :  { %2399 = vset.pattern.permute.xlu1 %v2745_v0  ;;  %2398 = vset.pattern.permute.xlu0 %v2745_v0  ;;  %v139_v3 = vld [vmem:[%s3124_s0 + $0x18] sm:$0xff]  ;;  %v137_v4 = vld [vmem:[%s3124_s0 + $0x8] sm:$0xff]  ;;  %v2401_v6 = vld [vmem:[#allocation2 + $0x8] sm:$0xff]   ;;  %v2746_v26 = vmov 0.0   ;;  %vm2747_vm5 = vmmov 0   ;;  %vm611_vm6 = vcmask 130048  }
  0x82   :  { %451 = vmatprep.mubr.bf16.mxu1 %v2745_v0  ;;  %147 = vperm.xlu1 %2399, %v138_v1   ;;  %v2400_v5 = vld [vmem:[#allocation2] sm:$0xff]   ;;  %v2405_v9 = vld [vmem:[#allocation7 + $0x8] ss:$12 sps:$4 sm:$0xff]   ;;  %v2412_v13 = vld [vmem:[#allocation7 + $0x30] ss:$12 sps:$4 sm:$0xff]   ;;  %v135_v21 = vand.u32 127, %v134_v20 }
  0x83   :  { %141 = vperm.xlu0 %2398, %v136_v2   ;;  %2185 = vmatprep.subr.bf16.mxu0 %v2400_v5  ;;  %v2402_v7 = vld [vmem:[#allocation7 + $0x4] ss:$12 sps:$4 sm:$0xff]   ;;  %v2404_v8 = vld [vmem:[#allocation7] ss:$12 sps:$4 sm:$0xff]   ;;  %v2406_v10 = vld [vmem:[#allocation7 + $0x1c] ss:$12 sps:$4 sm:$0xff]  }
  0x84   :  { %2186 = vmatpush3.bf16.msra.mxu0 %v2400_v5  ;;  %v2408_v11 = vld [vmem:[#allocation7 + $0x18] ss:$12 sps:$4 sm:$0xff]   ;;  %419 = vmatprep.subr.bf16.mxu1 %v2402_v7  ;;  %v2410_v12 = vld [vmem:[#allocation7 + $0x34] ss:$12 sps:$4 sm:$0xff]   ;;  %v2422_v18 = vld [vmem:[#allocation7 + $0x7c] ss:$12 sps:$4 sm:$0xff]  }
  0x85   :  { %2187 = vmatprep.subr.bf16.mxu0 %v2401_v6  ;;  %420 = vmatpush1.bf16.msra.mxu1 %v2404_v8  ;;  %v2414_v14 = vld [vmem:[#allocation7 + $0x4c] ss:$12 sps:$4 sm:$0xff]   ;;  %v2416_v15 = vld [vmem:[#allocation7 + $0x48] ss:$12 sps:$4 sm:$0xff]   ;;  %v2418_v16 = vld [vmem:[#allocation7 + $0x64] ss:$12 sps:$4 sm:$0xff]  }
  0x86   :  { %150 = vperm.xlu1 %2399, %v139_v3   ;;  %421 = vmatprep.subr.bf16.mxu1 %v2406_v10  ;;  %v2420_v17 = vld [vmem:[#allocation7 + $0x60] ss:$12 sps:$4 sm:$0xff]   ;;  %v2424_v19 = vld [vmem:[#allocation7 + $0x78] ss:$12 sps:$4 sm:$0xff]   ;;  %v2417_v35 = vld [vmem:[#allocation7 + $0x50] ss:$12 sps:$4 sm:$0xff]  }
  0x87   :  { %144 = vperm.xlu0 %2398, %v137_v4   ;;  %v2409_v33 = vld [vmem:[#allocation7 + $0x20] ss:$12 sps:$4 sm:$0xff]   ;;  %v2413_v34 = vld [vmem:[#allocation7 + $0x38] ss:$12 sps:$4 sm:$0xff]   ;;  %v2421_v36 = vld [vmem:[#allocation7 + $0x68] ss:$12 sps:$4 sm:$0xff]  }
  0x88   :  { %2188 = vmatpush3.bf16.msra.mxu0 %v2401_v6  ;;  %v2425_v37 = vld [vmem:[#allocation7 + $0x80] ss:$12 sps:$4 sm:$0xff]   ;;  %v2428_v39 = vld [vmem:[#allocation7 + $0x90] ss:$12 sps:$4 sm:$0xff]   ;;  %v2429_v40 = vld [vmem:[#allocation7 + $0x98] ss:$12 sps:$4 sm:$0xff]  }
  0x89   :  { %2193 = vmatprep.subr.bf16.mxu0 %v2405_v9  ;;  %422 = vmatpush1.bf16.msra.mxu1 %v2408_v11  ;;  %v2426_v38 = vld [vmem:[#allocation7 + $0x94] ss:$12 sps:$4 sm:$0xff]   ;;  %v2430_v41 = vld [vmem:[#allocation7 + $0xac] ss:$12 sps:$4 sm:$0xff]   ;;  %v2433_v43 = vld [vmem:[#allocation7 + $0xb0] ss:$12 sps:$4 sm:$0xff]  }
  0x8a   :  { %423 = vmatprep.subr.bf16.mxu1 %v2410_v12  ;;  %v2432_v42 = vld [vmem:[#allocation7 + $0xa8] ss:$12 sps:$4 sm:$0xff]   ;;  %v171_v45 = vld [vmem:[#allocation5 + $0x8] sm:$0xff]  ;;  %v2950_v56 = vshrl.u32 %v134_v20, 7 }
  0x8b   :  { %v170_v46 = vld [vmem:[#allocation5] sm:$0xff]  ;;  %v274_v58 = vld [vmem:[%s3128_s4] sm:$0x7] }
  0x8c   :  { %v278_v57 = vsub.s32 0, %v2950_v56  ;;  %v282_v59 = vsub.s32 1, %v2950_v56  ;;  %v286_v60 = vsub.s32 2, %v2950_v56 }
  0x8d   :  { %424 = vmatpush1.bf16.msra.mxu1 %v2412_v13 }
  0x8e   :  { %425 = vmatprep.subr.bf16.mxu1 %v2414_v14  ;;  %v279_v61 = vrot.slane %v274_v58, %v278_v57  ;;  %v283_v63 = vrot.slane %v274_v58, %v282_v59  ;;  %v287_v1 = vrot.slane %v274_v58, %v286_v60 }
  0x91   :  { %426 = vmatpush1.bf16.msra.mxu1 %v2416_v15 }
  0x92   :  { %427 = vmatprep.subr.bf16.mxu1 %v2418_v16 }
  0x95   :  { %428 = vmatpush1.bf16.msra.mxu1 %v2420_v17 }
  0x96   :  { %429 = vmatprep.subr.bf16.mxu1 %v2422_v18 }
  0x99   :  { %430 = vmatpush1.bf16.msra.mxu1 %v2424_v19 }
  0x9a   :  { %431 = vmatprep.subr.bf16.mxu1 %v2426_v38 }
  0x9d   :  { %432 = vmatpush1.bf16.msra.mxu1 %v2428_v39 }
  0x9e   :  { %433 = vmatprep.subr.bf16.mxu1 %v2430_v41 }
  0xa1   :  { %434 = vmatpush1.bf16.msra.mxu1 %v2432_v42 }
  0xa2   :  { %2231 = vmatprep.subr.bf16.mxu1 %v2746_v26 }
 0x101   :  { %v148_v22 = vpop.permute.xlu1 %147 }
 0x102   :  { %v142_v23 = vpop.permute.xlu0 %141  ;;  %vm154_vm0 = vcmp.eq.s32.totalorder %v148_v22, %v135_v21 }
 0x103   :  { %vm152_vm1 = vcmp.eq.s32.totalorder %v142_v23, %v135_v21  ;;  %v1988_v27 = vsel %vm154_vm0, 1.0, %v2746_v26 }
 0x104   :  { %v1986_v28 = vsel %vm152_vm1, 1.0, %v2746_v26 }
 0x105   :  { %v151_v24 = vpop.permute.xlu1 %150 }
 0x106   :  { %v145_v25 = vpop.permute.xlu0 %144  ;;  %vm155_vm2 = vcmp.eq.s32.totalorder %v151_v24, %v135_v21 }
 0x107   :  { %vm153_vm3 = vcmp.eq.s32.totalorder %v145_v25, %v135_v21  ;;  %v1989_v29 = vsel %vm155_vm2, 1.0, %v2746_v26 }
 0x108   :  { %v1987_v30 = vsel %vm153_vm3, 1.0, %v2746_v26  ;;  %v165_v31 = vpack.c.bf16 %v1989_v29, %v1988_v27 }
 0x109   :  { %v164_v32 = vpack.c.bf16 %v1987_v30, %v1986_v28 }
 0x10b   :  { %2189 = vmatprep.mubr.msk.bf16.mxu0 %vm184_vm4, %v164_v32 }
 0x10c   :  { %2190 = vmatmul.mubr.msk.bf16.vlgmr.msra.gmra.mrb[0].mxu0 %vm184_vm4, %v165_v31 }
 0x10d   :  { %2194 = vmatpush3.bf16.msra.mxu0 %v2405_v9 }
 0x10e   :  { %2195 = vmatprep.subr.bf16.mxu0 %v2409_v33 }
 0x111   :  { %2196 = vmatpush3.bf16.msra.mxu0 %v2409_v33 }
 0x112   :  { %2197 = vmatprep.subr.bf16.mxu0 %v2413_v34 }
 0x115   :  { %2198 = vmatpush3.bf16.msra.mxu0 %v2413_v34 }
 0x116   :  { %2199 = vmatprep.subr.bf16.mxu0 %v2417_v35 }
 0x119   :  { %2200 = vmatpush3.bf16.msra.mxu0 %v2417_v35 }
 0x11a   :  { %2201 = vmatprep.subr.bf16.mxu0 %v2421_v36 }
 0x11d   :  { %2202 = vmatpush3.bf16.msra.mxu0 %v2421_v36 }
 0x11e   :  { %2203 = vmatprep.subr.bf16.mxu0 %v2425_v37 }
 0x121   :  { %2204 = vmatpush3.bf16.msra.mxu0 %v2425_v37 }
 0x122   :  { %2205 = vmatprep.subr.bf16.mxu0 %v2429_v40 }
 0x125   :  { %2206 = vmatpush3.bf16.msra.mxu0 %v2429_v40 }
 0x126   :  { %2207 = vmatprep.subr.bf16.mxu0 %v2433_v43 }
 0x129   :  { %2208 = vmatpush3.bf16.msra.mxu0 %v2433_v43 }
 0x12a   :  { %2213 = vmatprep.subr.bf16.mxu0 %v2746_v26 }
 0x1df   :  { %v2191_v44 = vpop.f32.mrb[0].mxu0 }
 0x1e0   :  { %v225_v47 = vpop.f32.mrb[1].mxu0  ;;  %v2938_v53 = vadd.f32 %v2191_v44, %v170_v46 }
 0x1e1   :  { %v2192_v48 = vpop.f32.mrb[2].mxu0  ;;  %v2934_v51 = vadd.f32 %v225_v47, %v170_v46 }
 0x1e2   :  { %v2932_v49 = vadd.f32 %v2192_v48, %v171_v45  ;;  %v228_v50 = vpop.f32.mrb[3].mxu0 }
 0x1e3   :  { %v2936_v52 = vadd.f32 %v228_v50, %v171_v45 }
 0x1e4   :  { %v241_v55 = vpack.c.bf16 %v2932_v49, %v2938_v53 }
 0x1e5   :  { %v240_v54 = vpack.c.bf16 %v2936_v52, %v2934_v51 }
 0x1e7   :  { %452 = vmatmul.mubr.bf16.vlgmr.msra.gmra.mrb[0].mxu1 %v240_v54  ;;  %2209 = vmatprep.mubr.bf16.mxu0 %v240_v54 }
 0x1e8   :  { %2210 = vmatmul.mubr.bf16.vlgmr.msra.gmra.mrb[4].mxu0 %v241_v55  ;;  %461 = vmatprep.mubr.bf16.mxu1 %v2745_v0 }
 0x1e9   :  { %2215 = vmatprep.mubr.msk.bf16.mxu0 %vm2747_vm5, %v2746_v26 }
 0x1ef   :  { %462 = vmatmul.mubr.bf16.gmra.mrb[4].mxu1 %v241_v55 }
 0x1f0   :  { %2233 = vmatprep.mubr.msk.bf16.mxu1 %vm2747_vm5, %v2746_v26 }
 0x2ba   :  { %v453_v62 = vpop.f32.mrb[0].mxu1 }
 0x2bb   :  { %v455_v2 = vpop.f32.mrb[1].mxu1  ;;  %v2211_v3 = vpop.f32.mrb[4].mxu0  ;;  %v454_v6 = vadd.f32 %v453_v62, %v279_v61 }
 0x2bc   :  { %v457_v4 = vpop.f32.mrb[2].mxu1  ;;  %v506_v5 = vpop.f32.mrb[5].mxu0  ;;  %v456_v10 = vadd.f32 %v455_v2, %v283_v63  ;;  %v515_v11 = vadd.f32 %v2211_v3, %v287_v1 }
 0x2bd   :  { %v458_v7 = vadd.f32 %v457_v4, %v279_v61  ;;  %v459_v8 = vpop.f32.mrb[3].mxu1  ;;  %v2212_v9 = vpop.f32.mrb[6].mxu0  ;;  %v507_v16 = vadd.f32 %v506_v5, %v287_v1 }
 0x2be   :  { %v460_v12 = vadd.f32 %v459_v8, %v283_v63  ;;  %v518_v13 = vadd.f32 %v2212_v9, %v287_v1  ;;  %v509_v14 = vpop.f32.mrb[7].mxu0 }
 0x2bf   :  { %v521_v15 = vpack.c.bf16 %v458_v7, %v454_v6  ;;  %v510_v17 = vadd.f32 %v509_v14, %v287_v1 }
 0x2c0   :  { %v523_v18 = vpack.c.bf16 %v460_v12, %v456_v10  ;;  %v659_v19 = vpack.c.bf16 %v518_v13, %v515_v11  ;;  %v2434_v13 = vld [vmem:[#allocation8] sm:$0xff]  }
 0x2c1   :  { %v658_v20 = vpack.c.bf16 %v510_v17, %v507_v16 }
 0x2c2   :  { %v463_v21 = vpop.f32.mrb[4].mxu1  ;;  %2214 = vmatpush3.bf16.xpose.msra.mxu0 %v523_v18  ;;  %2232 = vmatpush3.bf16.msra.mxu1 %v659_v19 }
 0x2c3   :  { %v465_v22 = vpop.f32.mrb[5].mxu1  ;;  %2219 = vmatprep.subr.bf16.mxu0 %v2746_v26  ;;  %v464_v24 = vadd.f32 %v463_v21, %v279_v61 }
 0x2c4   :  { %v467_v23 = vpop.f32.mrb[6].mxu1  ;;  %v466_v28 = vadd.f32 %v465_v22, %v283_v63 }
 0x2c5   :  { %v468_v25 = vadd.f32 %v467_v23, %v279_v61  ;;  %v469_v27 = vpop.f32.mrb[7].mxu1  ;;  %v2435_v23 = vld [vmem:[#allocation8 + $0x8] sm:$0xff]  }
 0x2c6   :  { %v470_v29 = vadd.f32 %v469_v27, %v283_v63 }
 0x2c7   :  { %v522_v30 = vpack.c.bf16 %v468_v25, %v464_v24  ;;  %v2436_v24 = vld [vmem:[#allocation8 + $0x10] sm:$0xff]  }
 0x2c8   :  { %v524_v31 = vpack.c.bf16 %v470_v29, %v466_v28 }
 0x2c9   :  { %2216 = vmatmul.mubr.bf16.vlgmr.msra.gmra.mrb[8].mxu0 %v521_v15 }
 0x2ca   :  { %2220 = vmatpush3.bf16.xpose.msra.mxu0 %v524_v31  ;;  %2221 = vmatprep.mubr.msk.bf16.mxu0 %vm2747_vm5, %v2746_v26 }
 0x2cb   :  { %2225 = vmatprep.subr.bf16.mxu0 %v2746_v26 }
 0x2d1   :  { %2222 = vmatmul.mubr.bf16.vlgmr.msra.gmra.mrb[12].mxu0 %v522_v30  ;;  %v2437_v30 = vld [vmem:[#allocation8 + $0x18] sm:$0xff]  }
 0x2d2   :  { %2226 = vmatpush3.bf16.msra.mxu0 %v658_v20  ;;  %2227 = vmatprep.mubr.msk.bf16.mxu0 %vm2747_vm5, %v2746_v26 }
 0x2d3   :  { %2237 = vmatprep.subr.bf16.mxu0 %v2434_v13 }
 0x39c   :  { %v559_v32 = vpop.f32.mrb[8].mxu0 }
 0x39d   :  { %v607_v33 = vmul.f32 0.125, %v559_v32  ;;  %v2217_v34 = vpop.f32.mrb[9].mxu0  ;;  %v2438_v32 = vld [vmem:[#allocation8 + $0x20] sm:$0xff]  }
 0x39e   :  { %v562_v35 = vpop.f32.mrb[10].mxu0  ;;  %v2440_v34 = vld [vmem:[#allocation8 + $0x30] sm:$0xff]  }
 0x39f   :  { %v608_v36 = vmul.f32 0.125, %v562_v35  ;;  %v2218_v37 = vpop.f32.mrb[11].mxu0  ;;  %v612_v38 = vsel %vm611_vm6, %v607_v33, -inf  ;;  %v2441_v35 = vld [vmem:[#allocation8 + $0x38] sm:$0xff]  }
 0x3a0   :  { %613 = vmax.xlane.f32.xlu0 %v612_v38  ;;  %v2443_v37 = vld [vmem:[#allocation10 + $0x8] sm:$0xff]   ;;  %v2444_v38 = vld [vmem:[#allocation10 + $0x10] sm:$0xff]  }
 0x3a1   :  { %v615_v39 = vsel %vm611_vm6, %v608_v36, -inf }
 0x3a2   :  { %616 = vmax.xlane.f32.xlu1 %v615_v39  ;;  %v2445_v39 = vld [vmem:[#allocation10 + $0x18] sm:$0xff]  }
 0x3a4   :  { %v600_v40 = vpop.f32.mrb[12].mxu0 }
 0x3a5   :  { %v609_v41 = vmul.f32 0.125, %v600_v40  ;;  %v2223_v42 = vpop.f32.mrb[13].mxu0  ;;  %v2446_v40 = vld [vmem:[#allocation10 + $0x20] sm:$0xff]  }
 0x3a6   :  { %v603_v43 = vpop.f32.mrb[14].mxu0 }
 0x3a7   :  { %v610_v44 = vmul.f32 0.125, %v603_v43  ;;  %v2224_v45 = vpop.f32.mrb[15].mxu0  ;;  %v618_v46 = vsel %vm611_vm6, %v609_v41, -inf }
 0x3a8   :  { %619 = vmax.xlane.f32.xlu0 %v618_v46 }
 0x3a9   :  { %v621_v47 = vsel %vm611_vm6, %v610_v44, -inf }
 0x3ac   :  { %622 = vmax.xlane.f32.xlu0 %v621_v47 }
 0x42d   :  { %v614_v48 = vpop.xlane.xlu0 %613 }
 0x42e   :  { %v624_v50 = vsub.f32 %v607_v33, %v614_v48  ;;  %v2439_v33 = vld [vmem:[#allocation8 + $0x28] sm:$0xff]  }
 0x42f   :  { %v617_v54 = vpop.xlane.xlu1 %616 }
 0x430   :  { %v628_v55 = vmul.f32 1.442695, %v624_v50  ;;  %v625_v58 = vsub.f32 %v608_v36, %v617_v54  ;;  %v2442_v36 = vld [vmem:[#allocation10] sm:$0xff]  }
 0x431   :  { %2257 = vmatprep.subr.bf16.mxu1 %v2442_v36 }
 0x432   :  { %2506 = vpow2.f32 %v628_v55  ;;  %v630_v61 = vmul.f32 1.442695, %v625_v58 }
 0x434   :  { %2508 = vpow2.f32 %v630_v61 }
 0x435   :  { %v620_v62 = vpop.xlane.xlu0 %619 }
 0x436   :  { %v626_v63 = vsub.f32 %v609_v41, %v620_v62  ;;  %v2447_v41 = vld [vmem:[#allocation10 + $0x28] sm:$0xff]  }
 0x438   :  { %v632_v1 = vmul.f32 1.442695, %v626_v63  ;;  %v2449_v63 = vld [vmem:[#allocation10 + $0x38] sm:$0xff]  }
 0x439   :  { %v623_v2 = vpop.xlane.xlu0 %622 }
 0x43a   :  { %2510 = vpow2.f32 %v632_v1  ;;  %v627_v3 = vsub.f32 %v610_v44, %v623_v2  ;;  %v2450_v1 = vld [vmem:[#allocation7 + $0xc0] ss:$12 sps:$4 sm:$0xff]   ;;  %v2452_v2 = vld [vmem:[#allocation7 + $0xc4] ss:$12 sps:$4 sm:$0xff]  }
 0x43c   :  { %v2507_v4 = vpop.eup %2506  ;;  %v634_v5 = vmul.f32 1.442695, %v627_v3  ;;  %v2456_v3 = vld [vmem:[#allocation7 + $0xdc] ss:$12 sps:$4 sm:$0xff]  }
 0x43d   :  { %v636_v6 = vsel %vm611_vm6, %v2507_v4, 0.0 }
 0x43e   :  { %v2509_v7 = vpop.eup %2508  ;;  %2512 = vpow2.f32 %v634_v5  ;;  %637 = vadd.xlane.f32.xlu1 %v636_v6  ;;  %v2458_v5 = vld [vmem:[#allocation7 + $0xf0] ss:$12 sps:$4 sm:$0xff]   ;;  %v2464_v6 = vld [vmem:[#allocation7 + $0x10c] ss:$12 sps:$4 sm:$0xff]  }
 0x43f   :  { %v639_v8 = vsel %vm611_vm6, %v2509_v7, 0.0 }
 0x440   :  { %640 = vadd.xlane.f32.xlu0 %v639_v8  ;;  %v2468_v8 = vld [vmem:[#allocation7 + $0x124] ss:$12 sps:$4 sm:$0xff]  }
 0x444   :  { %v2511_v9 = vpop.eup %2510 }
 0x445   :  { %v642_v10 = vsel %vm611_vm6, %v2511_v9, 0.0 }
 0x446   :  { %643 = vadd.xlane.f32.xlu1 %v642_v10  ;;  %v2472_v10 = vld [vmem:[#allocation7 + $0x13c] ss:$12 sps:$4 sm:$0xff]  }
 0x448   :  { %v2513_v11 = vpop.eup %2512 }
 0x449   :  { %v645_v12 = vsel %vm611_vm6, %v2513_v11, 0.0 }
 0x44a   :  { %646 = vadd.xlane.f32.xlu0 %v645_v12  ;;  %v2020_v12 = vld [vmem:[%s3130_s6] ss:$0 sm:$0xff] }
 0x4cb   :  { %v638_v14 = vpop.xlane.xlu1 %637 }
 0x4cc   :  { %2514 = vrcp.f32 %v638_v14 }
 0x4cd   :  { %v641_v15 = vpop.xlane.xlu0 %640 }
 0x4ce   :  { %2516 = vrcp.f32 %v641_v15 }
 0x4d3   :  { %v644_v16 = vpop.xlane.xlu1 %643 }
 0x4d4   :  { %2518 = vrcp.f32 %v644_v16 }
 0x4d6   :  { %v2515_v17 = vpop.eup %2514 }
 0x4d7   :  { %v647_v18 = vpop.xlane.xlu0 %646  ;;  %v652_v20 = vmul.f32 %v2515_v17, %v2507_v4  ;;  %v2460_v4 = vld [vmem:[#allocation7 + $0xf4] ss:$12 sps:$4 sm:$0xff]  }
 0x4d8   :  { %v2517_v19 = vpop.eup %2516  ;;  %2520 = vrcp.f32 %v647_v18 }
 0x4d9   :  { %v653_v21 = vmul.f32 %v2517_v19, %v2509_v7  ;;  %v2462_v7 = vld [vmem:[#allocation7 + $0x108] ss:$12 sps:$4 sm:$0xff]  }
 0x4db   :  { %v656_v22 = vpack.c.bf16 %v653_v21, %v652_v20 }
 0x4dd   :  { %2228 = vmatmul.mubr.msk.bf16.vlgmr.msra.gmra.mrb[16].mxu0 %vm611_vm6, %v656_v22 }
 0x4de   :  { %2238 = vmatpush3.bf16.msra.mxu0 %v2434_v13  ;;  %v2519_v25 = vpop.eup %2518 }
 0x4df   :  { %2239 = vmatprep.subr.bf16.mxu0 %v2435_v23  ;;  %v654_v28 = vmul.f32 %v2519_v25, %v2511_v9  ;;  %v2466_v9 = vld [vmem:[#allocation7 + $0x120] ss:$12 sps:$4 sm:$0xff]  }
 0x4e2   :  { %v2521_v27 = vpop.eup %2520  ;;  %2240 = vmatpush3.bf16.msra.mxu0 %v2435_v23 }
 0x4e3   :  { %v655_v29 = vmul.f32 %v2521_v27, %v2513_v11  ;;  %2241 = vmatprep.subr.bf16.mxu0 %v2436_v24  ;;  %v2470_v11 = vld [vmem:[#allocation7 + $0x138] ss:$12 sps:$4 sm:$0xff]  }
 0x4e5   :  { %v657_v31 = vpack.c.bf16 %v655_v29, %v654_v28  ;;  %v2457_v28 = vld [vmem:[#allocation7 + $0xe0] ss:$12 sps:$4 sm:$0xff]   ;;  %v2461_v29 = vld [vmem:[#allocation7 + $0xf8] ss:$12 sps:$4 sm:$0xff]  }
 0x4e6   :  { %2242 = vmatpush3.bf16.msra.mxu0 %v2436_v24 }
 0x4e7   :  { %2234 = vmatmul.mubr.msk.bf16.vlgmr.msra.gmra.mrb[8].mxu1 %vm611_vm6, %v657_v31  ;;  %2243 = vmatprep.subr.bf16.mxu0 %v2437_v30  ;;  %v2469_v31 = vld [vmem:[#allocation7 + $0x128] ss:$12 sps:$4 sm:$0xff]  }
 0x4e8   :  { %2258 = vmatpush3.bf16.msra.mxu1 %v2442_v36  ;;  %v2480_v36 = vld [vmem:[#allocation7 + $0x16c] ss:$12 sps:$4 sm:$0xff]  }
 0x4e9   :  { %2259 = vmatprep.subr.bf16.mxu1 %v2443_v37 }
 0x4ea   :  { %2244 = vmatpush3.bf16.msra.mxu0 %v2437_v30  ;;  %v2465_v30 = vld [vmem:[#allocation7 + $0x110] ss:$12 sps:$4 sm:$0xff]  }
 0x4eb   :  { %2245 = vmatprep.subr.bf16.mxu0 %v2438_v32 }
 0x4ec   :  { %2260 = vmatpush3.bf16.msra.mxu1 %v2443_v37  ;;  %v2478_v37 = vld [vmem:[#allocation7 + $0x168] ss:$12 sps:$4 sm:$0xff]  }
 0x4ed   :  { %2261 = vmatprep.subr.bf16.mxu1 %v2444_v38 }
 0x4ee   :  { %2246 = vmatpush3.bf16.msra.mxu0 %v2438_v32  ;;  %v2473_v32 = vld [vmem:[#allocation7 + $0x140] ss:$12 sps:$4 sm:$0xff]  }
 0x4ef   :  { %2247 = vmatprep.subr.bf16.mxu0 %v2439_v33 }
 0x4f0   :  { %2262 = vmatpush3.bf16.msra.mxu1 %v2444_v38  ;;  %v2481_v38 = vld [vmem:[#allocation7 + $0x170] ss:$12 sps:$4 sm:$0xff]  }
 0x4f1   :  { %2263 = vmatprep.subr.bf16.mxu1 %v2445_v39 }
 0x4f2   :  { %2248 = vmatpush3.bf16.msra.mxu0 %v2439_v33  ;;  %v2476_v33 = vld [vmem:[#allocation7 + $0x154] ss:$12 sps:$4 sm:$0xff]  }
 0x4f3   :  { %2249 = vmatprep.subr.bf16.mxu0 %v2440_v34 }
 0x4f4   :  { %2264 = vmatpush3.bf16.msra.mxu1 %v2445_v39  ;;  %v2029_v39 = vld [vmem:[%s3132_s8] ss:$0 sm:$0xff] }
 0x4f5   :  { %2265 = vmatprep.subr.bf16.mxu1 %v2446_v40 }
 0x4f6   :  { %2250 = vmatpush3.bf16.msra.mxu0 %v2440_v34  ;;  %v2474_v34 = vld [vmem:[#allocation7 + $0x150] ss:$12 sps:$4 sm:$0xff]  }
 0x4f7   :  { %2251 = vmatprep.subr.bf16.mxu0 %v2441_v35 }
 0x4f8   :  { %2266 = vmatpush3.bf16.msra.mxu1 %v2446_v40 }
 0x4f9   :  { %2267 = vmatprep.subr.bf16.mxu1 %v2447_v41 }
 0x4fa   :  { %2252 = vmatpush3.bf16.msra.mxu0 %v2441_v35  ;;  %v2477_v35 = vld [vmem:[#allocation7 + $0x158] ss:$12 sps:$4 sm:$0xff]  }
 0x4fb   :  { %1185 = vmatprep.subr.bf16.mxu0 %v2452_v2 }
 0x4fc   :  { %2268 = vmatpush3.bf16.msra.mxu1 %v2447_v41 }
 0x5b0   :  { %v697_v42 = vpop.f32.mrb[16].mxu0 }
 0x5b1   :  { %v2229_v43 = vpop.f32.mrb[17].mxu0  ;;  %v2981_v45 = vadd.f32 %v697_v42, %v2934_v51 }
 0x5b2   :  { %v700_v44 = vpop.f32.mrb[18].mxu0 }
 0x5b3   :  { %v2984_v46 = vadd.f32 %v700_v44, %v2936_v52  ;;  %v2230_v47 = vpop.f32.mrb[19].mxu0  ;;  %v2448_v52 = vld [vmem:[#allocation10 + $0x30] sm:$0xff]  }
 0x5b4   :  { %2269 = vmatprep.subr.bf16.mxu1 %v2448_v52 }
 0x5b5   :  { %v752_v48 = vpack.c.bf16 %v2984_v46, %v2981_v45  ;;  %2270 = vmatpush3.bf16.msra.mxu1 %v2448_v52 }
 0x5b6   :  { %2271 = vmatprep.subr.bf16.mxu1 %v2449_v63 }
 0x5b7   :  { %2253 = vmatprep.mubr.bf16.mxu0 %v752_v48 }
 0x5b9   :  { %2272 = vmatpush3.bf16.msra.mxu1 %v2449_v63 }
 0x5ba   :  { %v741_v50 = vpop.f32.mrb[8].mxu1 }
 0x5bb   :  { %v2235_v54 = vpop.f32.mrb[9].mxu1  ;;  %v2989_v58 = vadd.f32 %v741_v50, %v2938_v53  ;;  %v2453_v53 = vld [vmem:[#allocation7 + $0xc8] ss:$12 sps:$4 sm:$0xff]  }
 0x5bc   :  { %v744_v55 = vpop.f32.mrb[10].mxu1  ;;  %2277 = vmatprep.subr.bf16.mxu1 %v2453_v53 }
 0x5bd   :  { %v2992_v61 = vadd.f32 %v744_v55, %v2932_v49  ;;  %v2236_v62 = vpop.f32.mrb[11].mxu1  ;;  %v2454_v49 = vld [vmem:[#allocation7 + $0xd8] ss:$12 sps:$4 sm:$0xff]  }
 0x5bf   :  { %v753_v51 = vpack.c.bf16 %v2992_v61, %v2989_v58 }
 0x5c1   :  { %2254 = vmatmul.mubr.bf16.vlgmr.msra.gmra.mrb[20].mxu0 %v753_v51 }
 0x5c2   :  { %1217 = vmatprep.mubr.bf16.mxu0 %v2745_v0  ;;  %1186 = vmatpush1.bf16.msra.mxu0 %v2450_v1 }
 0x5c3   :  { %1187 = vmatprep.subr.bf16.mxu0 %v2456_v3 }
 0x5c6   :  { %1188 = vmatpush1.bf16.msra.mxu0 %v2454_v49 }
 0x5c7   :  { %1189 = vmatprep.subr.bf16.mxu0 %v2460_v4 }
 0x5ca   :  { %1190 = vmatpush1.bf16.msra.mxu0 %v2458_v5 }
 0x5cb   :  { %1191 = vmatprep.subr.bf16.mxu0 %v2464_v6 }
 0x5ce   :  { %1192 = vmatpush1.bf16.msra.mxu0 %v2462_v7 }
 0x5cf   :  { %1193 = vmatprep.subr.bf16.mxu0 %v2468_v8 }
 0x5d2   :  { %1194 = vmatpush1.bf16.msra.mxu0 %v2466_v9 }
 0x5d3   :  { %1195 = vmatprep.subr.bf16.mxu0 %v2472_v10 }
 0x5d6   :  { %1196 = vmatpush1.bf16.msra.mxu0 %v2470_v11 }
 0x5d7   :  { %1197 = vmatprep.subr.bf16.mxu0 %v2476_v33 }
 0x5da   :  { %1198 = vmatpush1.bf16.msra.mxu0 %v2474_v34 }
 0x5db   :  { %1199 = vmatprep.subr.bf16.mxu0 %v2480_v36 }
 0x5de   :  { %1200 = vmatpush1.bf16.msra.mxu0 %v2478_v37 }
 0x5df   :  { %2303 = vmatprep.subr.bf16.mxu0 %v2746_v26 }
 0x694   :  { %v2255_v13 = vpop.f32.mrb[20].mxu0 }
 0x695   :  { %v868_v14 = vadd.f32 %v2255_v13, %v2020_v12  ;;  %v859_v15 = vpop.f32.mrb[21].mxu0 }
 0x696   :  { %v860_v16 = vadd.f32 %v2020_v12, %v859_v15  ;;  %v2256_v17 = vpop.f32.mrb[22].mxu0 }
 0x697   :  { %v871_v18 = vadd.f32 %v2256_v17, %v2020_v12  ;;  %v862_v19 = vpop.f32.mrb[23].mxu0  ;;  %v876_v21 = vmax.f32 %v868_v14, 0.0 }
 0x698   :  { %v863_v20 = vadd.f32 %v2020_v12, %v862_v19  ;;  %v874_v23 = vmax.f32 %v860_v16, 0.0 }
 0x699   :  { %v877_v22 = vmax.f32 %v871_v18, 0.0 }
 0x69a   :  { %v875_v24 = vmax.f32 %v863_v20, 0.0 }
 0x69b   :  { %v879_v25 = vpack.c.bf16 %v877_v22, %v876_v21 }
 0x69c   :  { %v878_v27 = vpack.c.bf16 %v875_v24, %v874_v23 }
 0x69e   :  { %2273 = vmatprep.mubr.bf16.mxu1 %v878_v27 }
 0x69f   :  { %2274 = vmatmul.mubr.bf16.vlgmr.msra.gmra.mrb[12].mxu1 %v879_v25 }
 0x6a0   :  { %2278 = vmatpush3.bf16.msra.mxu1 %v2453_v53 }
 0x6a1   :  { %2279 = vmatprep.subr.bf16.mxu1 %v2457_v28 }
 0x6a4   :  { %2280 = vmatpush3.bf16.msra.mxu1 %v2457_v28 }
 0x6a5   :  { %2281 = vmatprep.subr.bf16.mxu1 %v2461_v29 }
 0x6a8   :  { %2282 = vmatpush3.bf16.msra.mxu1 %v2461_v29 }
 0x6a9   :  { %2283 = vmatprep.subr.bf16.mxu1 %v2465_v30 }
 0x6ac   :  { %2284 = vmatpush3.bf16.msra.mxu1 %v2465_v30 }
 0x6ad   :  { %2285 = vmatprep.subr.bf16.mxu1 %v2469_v31 }
 0x6b0   :  { %2286 = vmatpush3.bf16.msra.mxu1 %v2469_v31 }
 0x6b1   :  { %2287 = vmatprep.subr.bf16.mxu1 %v2473_v32 }
 0x6b4   :  { %2288 = vmatpush3.bf16.msra.mxu1 %v2473_v32 }
 0x6b5   :  { %2289 = vmatprep.subr.bf16.mxu1 %v2477_v35 }
 0x6b8   :  { %2290 = vmatpush3.bf16.msra.mxu1 %v2477_v35 }
 0x6b9   :  { %2291 = vmatprep.subr.bf16.mxu1 %v2481_v38 }
 0x6bc   :  { %2292 = vmatpush3.bf16.msra.mxu1 %v2481_v38 }
 0x6bd   :  { %2297 = vmatprep.subr.bf16.mxu1 %v2746_v26 }
 0x772   :  { %v2275_v40 = vpop.f32.mrb[12].mxu1 }
 0x773   :  { %v985_v41 = vpop.f32.mrb[13].mxu1  ;;  %v994_v44 = vadd.f32 %v2275_v40, %v2029_v39 }
 0x774   :  { %v986_v42 = vadd.f32 %v2029_v39, %v985_v41  ;;  %v2276_v43 = vpop.f32.mrb[14].mxu1 }
 0x775   :  { %v997_v47 = vadd.f32 %v2276_v43, %v2029_v39  ;;  %v988_v48 = vpop.f32.mrb[15].mxu1  ;;  %v3015_v51 = vadd.f32 %v994_v44, %v2989_v58 }
 0x776   :  { %v989_v50 = vadd.f32 %v2029_v39, %v988_v48  ;;  %v3009_v55 = vadd.f32 %v986_v42, %v2981_v45  ;;  %v2038_v45 = vld [vmem:[%s3128_s4 + $0x3] sm:$0x7] }
 0x777   :  { %v3006_v54 = vadd.f32 %v997_v47, %v2992_v61  ;;  %v1049_v61 = vrot.slane %v2038_v45, %v282_v59 }
 0x778   :  { %v3012_v62 = vadd.f32 %v989_v50, %v2984_v46  ;;  %v1045_v46 = vrot.slane %v2038_v45, %v278_v57 }
 0x779   :  { %v1005_v63 = vpack.c.bf16 %v3006_v54, %v3015_v51 }
 0x77a   :  { %v1004_v52 = vpack.c.bf16 %v3012_v62, %v3009_v55 }
 0x77c   :  { %1218 = vmatmul.mubr.bf16.vlgmr.msra.gmra.mrb[24].mxu0 %v1004_v52  ;;  %2293 = vmatprep.mubr.bf16.mxu1 %v1004_v52 }
 0x77d   :  { %2294 = vmatmul.mubr.bf16.vlgmr.msra.gmra.mrb[16].mxu1 %v1005_v63  ;;  %1227 = vmatprep.mubr.bf16.mxu0 %v2745_v0  ;;  %v1053_v0 = vrot.slane %v2038_v45, %v286_v60 }
 0x77e   :  { %2299 = vmatprep.mubr.msk.bf16.mxu1 %vm2747_vm5, %v2746_v26 }
 0x784   :  { %1228 = vmatmul.mubr.bf16.gmra.mrb[28].mxu0 %v1005_v63 }
 0x785   :  { %2305 = vmatprep.mubr.msk.bf16.mxu0 %vm2747_vm5, %v2746_v26 }
 0x84f   :  { %v1219_v58 = vpop.f32.mrb[24].mxu0 }
 0x850   :  { %v1221_v1 = vpop.f32.mrb[25].mxu0  ;;  %v2295_v2 = vpop.f32.mrb[16].mxu1  ;;  %v1220_v49 = vadd.f32 %v1219_v58, %v1045_v46 }
 0x851   :  { %v1223_v53 = vpop.f32.mrb[26].mxu0  ;;  %v1272_v3 = vpop.f32.mrb[17].mxu1  ;;  %v1222_v7 = vadd.f32 %v1221_v1, %v1049_v61  ;;  %v1281_v8 = vadd.f32 %v2295_v2, %v1053_v0 }
 0x852   :  { %v1224_v4 = vadd.f32 %v1223_v53, %v1045_v46  ;;  %v1225_v5 = vpop.f32.mrb[27].mxu0  ;;  %v2296_v6 = vpop.f32.mrb[18].mxu1  ;;  %v1273_v12 = vadd.f32 %v1272_v3, %v1053_v0 }
 0x853   :  { %v1226_v9 = vadd.f32 %v1225_v5, %v1049_v61  ;;  %v1284_v10 = vadd.f32 %v2296_v6, %v1053_v0  ;;  %v1275_v57 = vpop.f32.mrb[19].mxu1 }
 0x854   :  { %v1287_v11 = vpack.c.bf16 %v1224_v4, %v1220_v49  ;;  %v1276_v13 = vadd.f32 %v1275_v57, %v1053_v0  ;;  %v2482_v4 = vld [vmem:[#allocation8 + $0x40] sm:$0xff]  }
 0x855   :  { %v1289_v59 = vpack.c.bf16 %v1226_v9, %v1222_v7  ;;  %v1424_v14 = vpack.c.bf16 %v1284_v10, %v1281_v8 }
 0x856   :  { %v1423_v56 = vpack.c.bf16 %v1276_v13, %v1273_v12  ;;  %v2483_v13 = vld [vmem:[#allocation8 + $0x48] sm:$0xff]  }
 0x857   :  { %v1229_v60 = vpop.f32.mrb[28].mxu0  ;;  %2298 = vmatpush3.bf16.xpose.msra.mxu1 %v1289_v59 }
 0x858   :  { %v1231_v15 = vpop.f32.mrb[29].mxu0  ;;  %2309 = vmatprep.subr.bf16.mxu1 %v2746_v26  ;;  %v1230_v17 = vadd.f32 %v1229_v60, %v1045_v46 }
 0x859   :  { %v1233_v16 = vpop.f32.mrb[30].mxu0  ;;  %v1232_v20 = vadd.f32 %v1231_v15, %v1049_v61 }
 0x85a   :  { %v1234_v18 = vadd.f32 %v1233_v16, %v1045_v46  ;;  %v1235_v19 = vpop.f32.mrb[31].mxu0 }
 0x85b   :  { %v1236_v21 = vadd.f32 %v1235_v19, %v1049_v61  ;;  %v2487_v19 = vld [vmem:[#allocation8 + $0x68] sm:$0xff]  }
 0x85c   :  { %v1288_v22 = vpack.c.bf16 %v1234_v18, %v1230_v17  ;;  %v2485_v17 = vld [vmem:[#allocation8 + $0x58] sm:$0xff]   ;;  %v2486_v18 = vld [vmem:[#allocation8 + $0x60] sm:$0xff]  }
 0x85d   :  { %v1290_v23 = vpack.c.bf16 %v1236_v21, %v1232_v20  ;;  %v2488_v20 = vld [vmem:[#allocation8 + $0x70] sm:$0xff]   ;;  %v2489_v21 = vld [vmem:[#allocation8 + $0x78] sm:$0xff]  }
 0x85e   :  { %2300 = vmatmul.mubr.bf16.vlgmr.msra.gmra.mrb[20].mxu1 %v1287_v11 }
 0x85f   :  { %2304 = vmatpush3.bf16.xpose.msra.mxu0 %v1290_v23  ;;  %2310 = vmatpush3.bf16.msra.mxu1 %v1423_v56  ;;  %v2491_v23 = vld [vmem:[#allocation10 + $0x48] sm:$0xff]  }
 0x860   :  { %2315 = vmatprep.subr.bf16.mxu0 %v2746_v26  ;;  %2311 = vmatprep.mubr.msk.bf16.mxu1 %vm2747_vm5, %v2746_v26 }
 0x861   :  { %2321 = vmatprep.subr.bf16.mxu1 %v2482_v4 }
 0x866   :  { %2306 = vmatmul.mubr.bf16.vlgmr.msra.gmra.mrb[32].mxu0 %v1288_v22  ;;  %v2490_v22 = vld [vmem:[#allocation10 + $0x40] sm:$0xff]  }
 0x867   :  { %2316 = vmatpush3.bf16.msra.mxu0 %v1424_v14  ;;  %2317 = vmatprep.mubr.msk.bf16.mxu0 %vm2747_vm5, %v2746_v26  ;;  %v2484_v14 = vld [vmem:[#allocation8 + $0x50] sm:$0xff]  }
 0x868   :  { %2341 = vmatprep.subr.bf16.mxu0 %v2490_v22 }
 0x931   :  { %v1325_v24 = vpop.f32.mrb[20].mxu1 }
 0x932   :  { %v1373_v25 = vmul.f32 0.125, %v1325_v24  ;;  %v2301_v27 = vpop.f32.mrb[21].mxu1  ;;  %v2492_v24 = vld [vmem:[#allocation10 + $0x50] sm:$0xff]  }
 0x933   :  { %v1328_v28 = vpop.f32.mrb[22].mxu1  ;;  %v2494_v27 = vld [vmem:[#allocation10 + $0x60] sm:$0xff]  }
 0x934   :  { %v1374_v29 = vmul.f32 0.125, %v1328_v28  ;;  %v2302_v30 = vpop.f32.mrb[23].mxu1  ;;  %v1377_v31 = vsel %vm611_vm6, %v1373_v25, -inf  ;;  %v2495_v28 = vld [vmem:[#allocation10 + $0x68] sm:$0xff]  }
 0x935   :  { %1378 = vmax.xlane.f32.xlu1 %v1377_v31 }
 0x936   :  { %v1380_v32 = vsel %vm611_vm6, %v1374_v29, -inf }
 0x937   :  { %1381 = vmax.xlane.f32.xlu0 %v1380_v32 }
 0x939   :  { %v1366_v33 = vpop.f32.mrb[32].mxu0 }
 0x93a   :  { %v1375_v34 = vmul.f32 0.125, %v1366_v33  ;;  %v2307_v35 = vpop.f32.mrb[33].mxu0 }
 0x93b   :  { %v1369_v36 = vpop.f32.mrb[34].mxu0 }
 0x93c   :  { %v1376_v37 = vmul.f32 0.125, %v1369_v36  ;;  %v2308_v38 = vpop.f32.mrb[35].mxu0  ;;  %v1383_v26 = vsel %vm611_vm6, %v1375_v34, -inf }
 0x93d   :  { %1384 = vmax.xlane.f32.xlu1 %v1383_v26 }
 0x93e   :  { %v1386_v39 = vsel %vm611_vm6, %v1376_v37, -inf }
 0x93f   :  { %1387 = vmax.xlane.f32.xlu0 %v1386_v39 }
 0x9c2   :  { %v1379_v40 = vpop.xlane.xlu1 %1378 }
 0x9c3   :  { %v1389_v41 = vsub.f32 %v1373_v25, %v1379_v40  ;;  %v2493_v25 = vld [vmem:[#allocation10 + $0x58] sm:$0xff]  }
 0x9c4   :  { %v1382_v42 = vpop.xlane.xlu0 %1381 }
 0x9c5   :  { %v1393_v43 = vmul.f32 1.442695, %v1389_v41  ;;  %v1390_v44 = vsub.f32 %v1374_v29, %v1382_v42  ;;  %v2496_v42 = vld [vmem:[#allocation10 + $0x70] sm:$0xff]  }
 0x9c7   :  { %2522 = vpow2.f32 %v1393_v43  ;;  %v1395_v47 = vmul.f32 1.442695, %v1390_v44  ;;  %v2497_v43 = vld [vmem:[#allocation10 + $0x78] sm:$0xff]  }
 0x9c9   :  { %2524 = vpow2.f32 %v1395_v47 }
 0x9ca   :  { %v1385_v48 = vpop.xlane.xlu1 %1384 }
 0x9cb   :  { %v1391_v50 = vsub.f32 %v1375_v34, %v1385_v48 }
 0x9cc   :  { %v1388_v52 = vpop.xlane.xlu0 %1387 }
 0x9cd   :  { %v1397_v63 = vmul.f32 1.442695, %v1391_v50  ;;  %v1392_v45 = vsub.f32 %v1376_v37, %v1388_v52 }
 0x9cf   :  { %2526 = vpow2.f32 %v1397_v63  ;;  %v1399_v46 = vmul.f32 1.442695, %v1392_v45 }
 0x9d1   :  { %v2523_v58 = vpop.eup %2522  ;;  %2528 = vpow2.f32 %v1399_v46 }
 0x9d2   :  { %v1401_v61 = vsel %vm611_vm6, %v2523_v58, 0.0 }
 0x9d3   :  { %v2525_v0 = vpop.eup %2524  ;;  %1402 = vadd.xlane.f32.xlu1 %v1401_v61 }
 0x9d4   :  { %v1404_v1 = vsel %vm611_vm6, %v2525_v0, 0.0 }
 0x9d5   :  { %1405 = vadd.xlane.f32.xlu0 %v1404_v1  ;;  %v2076_v1 = vld [vmem:[%s3132_s8 + $0x1] ss:$0 sm:$0xff] }
 0x9d9   :  { %v2527_v2 = vpop.eup %2526 }
 0x9da   :  { %v1407_v53 = vsel %vm611_vm6, %v2527_v2, 0.0 }
 0x9db   :  { %v2529_v3 = vpop.eup %2528  ;;  %1408 = vadd.xlane.f32.xlu1 %v1407_v53 }
 0x9dc   :  { %v1410_v49 = vsel %vm611_vm6, %v2529_v3, 0.0 }
 0x9dd   :  { %1411 = vadd.xlane.f32.xlu0 %v1410_v49 }
 0xa60   :  { %v1403_v5 = vpop.xlane.xlu1 %1402 }
 0xa61   :  { %2530 = vrcp.f32 %v1403_v5 }
 0xa62   :  { %v1406_v6 = vpop.xlane.xlu0 %1405 }
 0xa63   :  { %2532 = vrcp.f32 %v1406_v6 }
 0xa68   :  { %v1409_v7 = vpop.xlane.xlu1 %1408 }
 0xa69   :  { %2534 = vrcp.f32 %v1409_v7 }
 0xa6a   :  { %v1412_v8 = vpop.xlane.xlu0 %1411 }
 0xa6b   :  { %v2531_v9 = vpop.eup %2530  ;;  %2536 = vrcp.f32 %v1412_v8 }
 0xa6c   :  { %v1417_v57 = vmul.f32 %v2531_v9, %v2523_v58 }
 0xa6d   :  { %v2533_v10 = vpop.eup %2532 }
 0xa6e   :  { %v1418_v11 = vmul.f32 %v2533_v10, %v2525_v0 }
 0xa70   :  { %v1421_v12 = vpack.c.bf16 %v1418_v11, %v1417_v57 }
 0xa72   :  { %2312 = vmatmul.mubr.msk.bf16.vlgmr.msra.gmra.mrb[24].mxu1 %vm611_vm6, %v1421_v12 }
 0xa73   :  { %v2535_v59 = vpop.eup %2534  ;;  %2322 = vmatpush3.bf16.msra.mxu1 %v2482_v4 }
 0xa74   :  { %2323 = vmatprep.subr.bf16.mxu1 %v2483_v13  ;;  %v1419_v60 = vmul.f32 %v2535_v59, %v2527_v2 }
 0xa75   :  { %v2537_v56 = vpop.eup %2536 }
 0xa76   :  { %v1420_v15 = vmul.f32 %v2537_v56, %v2529_v3  ;;  %v2499_v56 = vld [vmem:[%s3135_s11 + $0x8] sm:$0xff]  }
 0xa77   :  { %2324 = vmatpush3.bf16.msra.mxu1 %v2483_v13 }
 0xa78   :  { %v1422_v16 = vpack.c.bf16 %v1420_v15, %v1419_v60  ;;  %2325 = vmatprep.subr.bf16.mxu1 %v2484_v14  ;;  %v2500_v60 = vld [vmem:[%s3135_s11 + $0x10] sm:$0xff]   ;;  %v2501_v15 = vld [vmem:[%s3135_s11 + $0x18] sm:$0xff]  }
 0xa7a   :  { %2318 = vmatmul.mubr.msk.bf16.vlgmr.msra.gmra.mrb[36].mxu0 %vm611_vm6, %v1422_v16  ;;  %v2502_v16 = vld [vmem:[%s3135_s11 + $0x20] sm:$0xff]  }
 0xa7b   :  { %2326 = vmatpush3.bf16.msra.mxu1 %v2484_v14  ;;  %2342 = vmatpush3.bf16.msra.mxu0 %v2490_v22  ;;  %v2498_v14 = vld [vmem:[%s3135_s11] sm:$0xff]  }
 0xa7c   :  { %2327 = vmatprep.subr.bf16.mxu1 %v2485_v17  ;;  %2343 = vmatprep.subr.bf16.mxu0 %v2491_v23 }
 0xa7f   :  { %2328 = vmatpush3.bf16.msra.mxu1 %v2485_v17  ;;  %2344 = vmatpush3.bf16.msra.mxu0 %v2491_v23  ;;  %v2503_v17 = vld [vmem:[%s3135_s11 + $0x28] sm:$0xff]  }
 0xa80   :  { %2329 = vmatprep.subr.bf16.mxu1 %v2486_v18  ;;  %2345 = vmatprep.subr.bf16.mxu0 %v2492_v24 }
 0xa83   :  { %2330 = vmatpush3.bf16.msra.mxu1 %v2486_v18  ;;  %2346 = vmatpush3.bf16.msra.mxu0 %v2492_v24  ;;  %v2504_v18 = vld [vmem:[%s3135_s11 + $0x30] sm:$0xff]  }
 0xa84   :  { %2331 = vmatprep.subr.bf16.mxu1 %v2487_v19  ;;  %2347 = vmatprep.subr.bf16.mxu0 %v2493_v25 }
 0xa87   :  { %2332 = vmatpush3.bf16.msra.mxu1 %v2487_v19  ;;  %2348 = vmatpush3.bf16.msra.mxu0 %v2493_v25  ;;  %v2505_v19 = vld [vmem:[%s3135_s11 + $0x38] sm:$0xff]   ;;  %s2748_s11 = smov [#allocation14]  }
 0xa88   :  { %2333 = vmatprep.subr.bf16.mxu1 %v2488_v20  ;;  %2349 = vmatprep.subr.bf16.mxu0 %v2494_v27  ;;  %s1971_s16 = sshll.u32 %s2748_s11, 4  ;;  %s1972_s16 = int_to_ptr.vmem [resolvable:$true] %s1971_s16 }
 0xa89   :  { %s2700_s3 = scalar_lea.vmem %s1972_s16, 512  ;;  %p2705_p1 = scmp.lt.s32.totalorder %s1972_s16, %s1972_s16 }
 0xa8a   :  { %p2701_p0 = scmp.ne.s32.totalorder %s1972_s16, %s2700_s3  ;;  %p2706_p2 = scmp.lt.s32.totalorder %s2700_s3, %s2700_s3 }
 0xa8b   :  { %2334 = vmatpush3.bf16.msra.mxu1 %v2488_v20  ;;  %2350 = vmatpush3.bf16.msra.mxu0 %v2494_v27 }
 0xa8c   :  { %2335 = vmatprep.subr.bf16.mxu1 %v2489_v21  ;;  %2351 = vmatprep.subr.bf16.mxu0 %v2495_v28  ;;  %p2707_p3 = por %p2706_p2, %p2705_p1 }
 0xa8e   :  { %p2708_p4 = pnand %p2707_p3, %p2701_p0 }
 0xa8f   :  { %2336 = vmatpush3.bf16.msra.mxu1 %v2489_v21  ;;  %2352 = vmatpush3.bf16.msra.mxu0 %v2495_v28 }
 0xa90   :  { %2353 = vmatprep.subr.bf16.mxu0 %v2496_v42  ;;  %2361 = vmatprep.subr.bf16.mxu1 %v2498_v14 }
 0xa93   :  { %2354 = vmatpush3.bf16.msra.mxu0 %v2496_v42 }
 0xa94   :  { %2355 = vmatprep.subr.bf16.mxu0 %v2497_v43 }
 0xa97   :  { %2356 = vmatpush3.bf16.msra.mxu0 %v2497_v43 }
 0xb45   :  { %v1462_v29 = vpop.f32.mrb[24].mxu1 }
 0xb46   :  { %v2313_v30 = vpop.f32.mrb[25].mxu1  ;;  %v1513_v32 = vadd.f32 %v1462_v29, %v3009_v55  ;;  %v2066_v55 = vld [vmem:[%s3130_s6 + $0x1] ss:$0 sm:$0xff] }
 0xb47   :  { %v1465_v31 = vpop.f32.mrb[26].mxu1 }
 0xb48   :  { %v1514_v33 = vadd.f32 %v1465_v31, %v3012_v62  ;;  %v2314_v34 = vpop.f32.mrb[27].mxu1 }
 0xb4a   :  { %v1517_v35 = vpack.c.bf16 %v1514_v33, %v1513_v32 }
 0xb4c   :  { %2337 = vmatprep.mubr.bf16.mxu1 %v1517_v35 }
 0xb4d   :  { %v1506_v36 = vpop.f32.mrb[36].mxu0 }
 0xb4e   :  { %v2319_v37 = vpop.f32.mrb[37].mxu0  ;;  %v1515_v26 = vadd.f32 %v1506_v36, %v3015_v51 }
 0xb4f   :  { %v1509_v38 = vpop.f32.mrb[38].mxu0 }
 0xb50   :  { %v1516_v39 = vadd.f32 %v1509_v38, %v3006_v54  ;;  %v2320_v40 = vpop.f32.mrb[39].mxu0 }
 0xb52   :  { %v1518_v41 = vpack.c.bf16 %v1516_v39, %v1515_v26 }
 0xb54   :  { %2338 = vmatmul.mubr.bf16.vlgmr.msra.gmra.mrb[28].mxu1 %v1518_v41 }
 0xb55   :  { %2362 = vmatpush3.bf16.msra.mxu1 %v2498_v14 }
 0xb56   :  { %2363 = vmatprep.subr.bf16.mxu1 %v2499_v56 }
 0xb59   :  { %2364 = vmatpush3.bf16.msra.mxu1 %v2499_v56 }
 0xb5a   :  { %2365 = vmatprep.subr.bf16.mxu1 %v2500_v60 }
 0xb5d   :  { %2366 = vmatpush3.bf16.msra.mxu1 %v2500_v60 }
 0xb5e   :  { %2367 = vmatprep.subr.bf16.mxu1 %v2501_v15 }
 0xb61   :  { %2368 = vmatpush3.bf16.msra.mxu1 %v2501_v15 }
 0xb62   :  { %2369 = vmatprep.subr.bf16.mxu1 %v2502_v16 }
 0xb65   :  { %2370 = vmatpush3.bf16.msra.mxu1 %v2502_v16 }
 0xb66   :  { %2371 = vmatprep.subr.bf16.mxu1 %v2503_v17 }
 0xb69   :  { %2372 = vmatpush3.bf16.msra.mxu1 %v2503_v17 }
 0xb6a   :  { %2373 = vmatprep.subr.bf16.mxu1 %v2504_v18 }
 0xb6d   :  { %2374 = vmatpush3.bf16.msra.mxu1 %v2504_v18 }
 0xb6e   :  { %2375 = vmatprep.subr.bf16.mxu1 %v2505_v19 }
 0xb71   :  { %2376 = vmatpush3.bf16.msra.mxu1 %v2505_v19 }
 0xc27   :  { %v2339_v62 = vpop.f32.mrb[28].mxu1 }
 0xc28   :  { %v1635_v44 = vadd.f32 %v2339_v62, %v2066_v55  ;;  %v1626_v47 = vpop.f32.mrb[29].mxu1 }
 0xc29   :  { %v1627_v48 = vadd.f32 %v2066_v55, %v1626_v47  ;;  %v2340_v51 = vpop.f32.mrb[30].mxu1 }
 0xc2a   :  { %v1638_v50 = vadd.f32 %v2340_v51, %v2066_v55  ;;  %v1629_v54 = vpop.f32.mrb[31].mxu1  ;;  %v1643_v63 = vmax.f32 %v1635_v44, 0.0 }
 0xc2b   :  { %v1630_v52 = vadd.f32 %v2066_v55, %v1629_v54  ;;  %v1641_v46 = vmax.f32 %v1627_v48, 0.0 }
 0xc2c   :  { %v1644_v45 = vmax.f32 %v1638_v50, 0.0  ;;  %v2085_v50 = vld [vmem:[#allocation11] ss:$0 sm:$0xff] }
 0xc2d   :  { %v1642_v58 = vmax.f32 %v1630_v52, 0.0 }
 0xc2e   :  { %v1646_v61 = vpack.c.bf16 %v1644_v45, %v1643_v63 }
 0xc2f   :  { %v1645_v0 = vpack.c.bf16 %v1642_v58, %v1641_v46 }
 0xc31   :  { %2357 = vmatprep.mubr.bf16.mxu0 %v1645_v0  ;;  %v2086_v0 = vld [vmem:[#allocation13] ss:$0 sm:$0xff] }
 0xc32   :  { %2358 = vmatmul.mubr.bf16.vlgmr.msra.gmra.mrb[40].mxu0 %v1646_v61 }
 0xd05   :  { %v2359_v2 = vpop.f32.mrb[40].mxu0 }
 0xd06   :  { %v1763_v53 = vadd.f32 %v2359_v2, %v2076_v1  ;;  %v1754_v3 = vpop.f32.mrb[41].mxu0 }
 0xd07   :  { %v2360_v49 = vpop.f32.mrb[42].mxu0  ;;  %v1755_v5 = vadd.f32 %v2076_v1, %v1754_v3 }
 0xd08   :  { %v3061_v4 = vadd.f32 %v1763_v53, %v1515_v26  ;;  %v1766_v6 = vadd.f32 %v2360_v49, %v2076_v1  ;;  %v1757_v7 = vpop.f32.mrb[43].mxu0 }
 0xd09   :  { %v1758_v9 = vadd.f32 %v2076_v1, %v1757_v7  ;;  %v3066_v10 = vadd.f32 %v1755_v5, %v1513_v32 }
 0xd0a   :  { %v3063_v8 = vadd.f32 %v1766_v6, %v1516_v39  ;;  %1777 = vadd.xlane.f32.xlu1 %v3061_v4  ;;  %v1787_v13 = vmul.f32 %v3061_v4, %v3061_v4 }
 0xd0b   :  { %v3069_v57 = vadd.f32 %v1758_v9, %v1514_v33  ;;  %v1785_v11 = vmul.f32 %v3066_v10, %v3066_v10 }
 0xd0c   :  { %1779 = vadd.xlane.f32.xlu0 %v3063_v8  ;;  %v1788_v59 = vmul.f32 %v3063_v8, %v3063_v8 }
 0xd0d   :  { %v1786_v12 = vmul.f32 %v3069_v57, %v3069_v57 }
 0xd0e   :  { %1773 = vadd.xlane.f32.xlu1 %v3066_v10 }
 0xd10   :  { %1775 = vadd.xlane.f32.xlu0 %v3069_v57 }
 0xd12   :  { %1789 = vadd.xlane.f32.xlu1 %v1785_v11 }
 0xd14   :  { %1791 = vadd.xlane.f32.xlu0 %v1786_v12 }
 0xd16   :  { %1793 = vadd.xlane.f32.xlu1 %v1787_v13 }
 0xd18   :  { %1795 = vadd.xlane.f32.xlu0 %v1788_v59 }
 0xd97   :  { %v1778_v20 = vpop.xlane.xlu1 %1777 }
 0xd98   :  { %v1783_v28 = vmul.f32 0.015625, %v1778_v20 }
 0xd99   :  { %v1780_v21 = vpop.xlane.xlu0 %1779 }
 0xd9a   :  { %v1784_v31 = vmul.f32 0.015625, %v1780_v21  ;;  %v1803_v37 = vmul.f32 %v1783_v28, %v1783_v28  ;;  %v1811_v45 = vsub.f32 %v3061_v4, %v1783_v28 }
 0xd9b   :  { %v1774_v22 = vpop.xlane.xlu1 %1773 }
 0xd9c   :  { %v1781_v23 = vmul.f32 0.015625, %v1774_v22  ;;  %v1804_v40 = vmul.f32 %v1784_v31, %v1784_v31  ;;  %v1812_v1 = vsub.f32 %v3063_v8, %v1784_v31 }
 0xd9d   :  { %v1776_v24 = vpop.xlane.xlu0 %1775 }
 0xd9e   :  { %v1782_v25 = vmul.f32 0.015625, %v1776_v24  ;;  %v1801_v29 = vmul.f32 %v1781_v23, %v1781_v23  ;;  %v1809_v48 = vsub.f32 %v3066_v10, %v1781_v23 }
 0xd9f   :  { %v1790_v27 = vpop.xlane.xlu1 %1789 }
 0xda0   :  { %v1797_v30 = vmul.f32 0.015625, %v1790_v27  ;;  %v1802_v33 = vmul.f32 %v1782_v25, %v1782_v25  ;;  %v1810_v54 = vsub.f32 %v3069_v57, %v1782_v25 }
 0xda1   :  { %v1792_v32 = vpop.xlane.xlu0 %1791 }
 0xda2   :  { %v1805_v34 = vsub.f32 %v1797_v30, %v1801_v29  ;;  %v1798_v35 = vmul.f32 0.015625, %v1792_v32 }
 0xda3   :  { %v1794_v36 = vpop.xlane.xlu1 %1793 }
 0xda4   :  { %v1813_v38 = vadd.f32 1e-05, %v1805_v34  ;;  %v1806_v26 = vsub.f32 %v1798_v35, %v1802_v33  ;;  %v1799_v39 = vmul.f32 0.015625, %v1794_v36 }
 0xda5   :  { %v1796_v41 = vpop.xlane.xlu0 %1795 }
 0xda6   :  { %2538 = vrsqrt.f32 %v1813_v38  ;;  %v1814_v42 = vadd.f32 1e-05, %v1806_v26  ;;  %v1807_v43 = vsub.f32 %v1799_v39, %v1803_v37  ;;  %v1800_v55 = vmul.f32 0.015625, %v1796_v41 }
 0xda8   :  { %2540 = vrsqrt.f32 %v1814_v42  ;;  %v1815_v62 = vadd.f32 1e-05, %v1807_v43  ;;  %v1808_v44 = vsub.f32 %v1800_v55, %v1804_v40 }
 0xdaa   :  { %2542 = vrsqrt.f32 %v1815_v62  ;;  %v1816_v47 = vadd.f32 1e-05, %v1808_v44 }
 0xdac   :  { %2544 = vrsqrt.f32 %v1816_v47 }
 0xdb0   :  { %v2539_v51 = vpop.eup %2538 }
 0xdb1   :  { %v1821_v52 = vmul.f32 %v2539_v51, %v1809_v48 }
 0xdb2   :  { %v2541_v63 = vpop.eup %2540 }
 0xdb3   :  { %v1822_v46 = vmul.f32 %v2541_v63, %v1810_v54  ;;  %v1832_v58 = vmul.f32 %v2085_v50, %v1821_v52 }
 0xdb4   :  { %v2543_v61 = vpop.eup %2542 }
 0xdb5   :  { %v1833_v2 = vmul.f32 %v2085_v50, %v1822_v46  ;;  %v1823_v53 = vmul.f32 %v2543_v61, %v1811_v45  ;;  %v1843_v49 = vadd.f32 %v2086_v0, %v1832_v58 }
 0xdb6   :  { %v2545_v3 = vpop.eup %2544 }
 0xdb7   :  { %v1844_v5 = vadd.f32 %v2086_v0, %v1833_v2  ;;  %v1824_v6 = vmul.f32 %v2545_v3, %v1812_v1  ;;  %v1834_v7 = vmul.f32 %v2085_v50, %v1823_v53 }
 0xdb9   :  { %v1847_v9 = vpack.c.bf16 %v1844_v5, %v1843_v49  ;;  %v1835_v10 = vmul.f32 %v2085_v50, %v1824_v6  ;;  %v1845_v57 = vadd.f32 %v2086_v0, %v1834_v7 }
 0xdbb   :  { %2377 = vmatprep.mubr.bf16.mxu1 %v1847_v9  ;;  %v1846_v11 = vadd.f32 %v2086_v0, %v1835_v10 }
 0xdbd   :  { %v1848_v12 = vpack.c.bf16 %v1846_v11, %v1845_v57 }
 0xdbf   :  { %2378 = vmatmul.mubr.bf16.vlgmr.msra.gmra.mrb[32].mxu1 %v1848_v12 }
 0xe92   :  { %v2379_v4 = vpop.f32.mrb[32].mxu1 }
 0xe93   :  { %1964 = vst [vmem:[#allocation14 + $0x10] sm:$0xff] %v2379_v4  ;;  %v1947_v13 = vpop.f32.mrb[33].mxu1 }
 0xe94   :  { %1962 = vst [vmem:[#allocation14] sm:$0xff] %v1947_v13  ;;  %v2380_v8 = vpop.f32.mrb[34].mxu1 }
 0xe95   :  { %1965 = vst [vmem:[#allocation14 + $0x18] sm:$0xff] %v2380_v8  ;;  %v1950_v59 = vpop.f32.mrb[35].mxu1 }
 0xe96   :  { %1963 = vst [vmem:[#allocation14 + $0x8] sm:$0xff] %v1950_v59 }
 0xe97   :  { %2711 = shalt.err (!%p2708_p4)
}
 0xe98   :  { %s2712_s19 = scalar_lea.hbm %s3136_s12, 512 }
 0xe99   :  { %p2713_p5 = scmp.ne.s32.totalorder %s3136_s12, %s2712_s19  ;;  %p2716_p6 = scmp.lt.u32.totalorder %s2712_s19, %s3136_s12 }
 0xe9b   :  { %p2718_p7 = pnand %p2716_p6, %p2713_p5 }
 0xe9d   :  { %2721 = shalt.err (!%p2718_p7)
}
 0xe9e   :  { %1977 = dma.vmem_to_hbm [thread:$0]  %s1972_s16, 512, %s3136_s12, [#allocation4], %s2733_s13, %s2733_s13, %s2734_s14  }
 0xe9f   :  { %2730 = dma.done.wait [#allocation4], 512  }
 0xea0   :  { %2731 = vsyncadd [#allocation4], 4294966784 }
 0xea1   :  { %1981 = vsyncpa [#allocation3], 1 }
 0xea2   :  { %1982 = vsyncpa [#allocation6], 1 }
 0xea3   :  { %1983 = vsyncpa [#allocation9], 1 }
 0xea4   :  { %1984 = vsyncpa [#allocation12], 1 }
 0xea5   :  { %1985 = vsyncpa [#allocation4], 1 }

</bundles_post_ra>
